<compile_context>
chip_gen: v7x
topology: tpu7x:2x2x1
jax: 0.10.0
libtpu: 0.0.40
codegen_flags: <defaults>
</compile_context>

<pallas_src>
import jax
import jax.numpy as jnp
from jax.experimental import pallas as pl
from jax.experimental.pallas import tpu as pltpu


D_IN, H1, H2, H3, D_OUT = 2, 128, 256, 128, 64


def _round_up(x, m):
    return ((x + m - 1) // m) * m


def _choose_block_batch(n, max_block=2048, min_block=256):
    """Biggest tile that still leaves >=8 grid steps when the batch allows it.

    Big tiles amortize per-step pipeline overhead; multiple steps let the
    'parallel' batch axis shard across both TensorCores on v7x."""
    return int(min(max_block, _round_up(max(n // 8, min_block), min_block)))


def _default_bf16_epilogue():
    """bf16 elementwise epilogue only where the VPU is bf16-native (v6e/v7x);
    v5e and older keep f32 elementwise math (bf16 VALU emulated there)."""
    try:
        kind = jax.devices()[0].device_kind.lower()
    except Exception:
        return True
    return not any(t in kind for t in ("v2", "v3", "v4", "v5"))


def _make_kernel(bf16_epilogue):
    def _mlp_kernel(x_ref,
                    w1_ref, b1_ref,
                    w2_ref, b2_ref,
                    w3_ref, b3_ref,
                    w4_ref, b4_ref,
                    o_ref):
        # x tile: (block_batch, 2) f32
        x = x_ref[...].astype(jnp.float32)

        # ---- Layer 1 (K=2): VPU broadcast-FMAs; skips a nearly-empty MXU pass.
        w1 = w1_ref[...]                                       # (2, 128) f32
        h = x[:, 0:1] * w1[0:1, :] + x[:, 1:2] * w1[1:2, :] + b1_ref[...]
        h = jnp.maximum(h, 0.0).astype(jnp.bfloat16)           # (B, 128) bf16

        # ---- Layer 2: bf16 MXU operands, f32 accumulation.
        h = jnp.dot(h, w2_ref[...], preferred_element_type=jnp.float32)
        if bf16_epilogue:   # bias-add + ReLU in bf16 (bf16-native VPU)
            h = jnp.maximum(h.astype(jnp.bfloat16) + b2_ref[...], 0)
        else:               # f32 epilogue (v5e), cast at MXU boundary only
            h = jnp.maximum(h + b2_ref[...], 0.0).astype(jnp.bfloat16)

        # ---- Layer 3.
        h = jnp.dot(h, w3_ref[...], preferred_element_type=jnp.float32)
        if bf16_epilogue:
            h = jnp.maximum(h.astype(jnp.bfloat16) + b3_ref[...], 0)
        else:
            h = jnp.maximum(h + b3_ref[...], 0.0).astype(jnp.bfloat16)

        # ---- Layer 4 (output): keep the f32 accumulator + f32 bias.
        h = jnp.dot(h, w4_ref[...], preferred_element_type=jnp.float32) + b4_ref[...]

        # Dropout(0.2) in eval mode == identity.  Store the 64-wide block
        # directly (no padded slab; HBM write is dense via the block DMA).
        o_ref[...] = h.astype(o_ref.dtype)

    return _mlp_kernel


def embedding_net_forward(x, params, *, block_batch=None, bf16_epilogue=None,
                          out_dtype=None):
    """x: (N, 2) float32.  params: dict of f32 weights (in,out) and biases (1,out)."""
    n = x.shape[0]
    if block_batch is None:
        block_batch = _choose_block_batch(n)
    if bf16_epilogue is None:
        bf16_epilogue = _default_bf16_epilogue()
    out_dtype = jnp.dtype(x.dtype if out_dtype is None else out_dtype)

    n_pad = pl.cdiv(n, block_batch) * block_batch
    if n_pad != n:
        x = jnp.pad(x, ((0, n_pad - n), (0, 0)))

    # Weight prep: layer-1 stays f32 (VPU); layers 2-4 are bf16 MXU operands.
    ep_dt = jnp.bfloat16 if bf16_epilogue else jnp.float32
    w1 = params["w1"].astype(jnp.float32)       # (2, 128)
    b1 = params["b1"].astype(jnp.float32)       # (1, 128)
    w2 = params["w2"].astype(jnp.bfloat16)      # (128, 256)
    b2 = params["b2"].astype(ep_dt)             # (1, 256)
    w3 = params["w3"].astype(jnp.bfloat16)      # (256, 128)
    b3 = params["b3"].astype(ep_dt)             # (1, 128)
    w4 = params["w4"].astype(jnp.bfloat16)      # (128, 64)  -- NOT padded to 128
    b4 = params["b4"].astype(jnp.float32)       # (1, 64)

    grid = (n_pad // block_batch,)

    # Constant block index -> weights/biases resident in VMEM across all steps.
    def rep(arr):
        return pl.BlockSpec(arr.shape, lambda i: (0, 0))

    weights = (w1, b1, w2, b2, w3, b3, w4, b4)
    flops = 2 * n_pad * (D_IN * H1 + H1 * H2 + H2 * H3 + H3 * D_OUT)
    bytes_accessed = (n_pad * (D_IN * x.dtype.itemsize + D_OUT * out_dtype.itemsize)
                      + sum(int(a.size) * a.dtype.itemsize for a in weights))
    cost = pl.CostEstimate(flops=flops, transcendentals=0,
                           bytes_accessed=int(bytes_accessed))

    out = pl.pallas_call(
        _make_kernel(bf16_epilogue),
        out_shape=jax.ShapeDtypeStruct((n_pad, D_OUT), out_dtype),
        grid_spec=pltpu.PrefetchScalarGridSpec(
            num_scalar_prefetch=0,
            grid=grid,
            in_specs=[
                pl.BlockSpec((block_batch, D_IN), lambda i: (i, 0)),
                rep(w1), rep(b1),
                rep(w2), rep(b2),
                rep(w3), rep(b3),
                rep(w4), rep(b4),
            ],
            out_specs=pl.BlockSpec((block_batch, D_OUT), lambda i: (i, 0)),
        ),
        compiler_params=pltpu.CompilerParams(
            # Batch-tile axis shards across both TensorCores on v7x.
            dimension_semantics=("parallel",),
            # Explicit so 2048-row tiles are safe under v5e's 16 MiB default;
            # 32 MiB is within every generation's physical VMEM.
            vmem_limit_bytes=32 * 1024 * 1024,
        ),
        cost_estimate=cost,
    )(x, *weights)

    # Only a row truncation remains (no column slice / extra HBM pass).
    return out if n == n_pad else out[:n]


def init_params(key):
    """Deterministic synthetic init (uniform, PyTorch Linear fan-in scale).

    Weights are stored pre-transposed as (in_features, out_features)."""
    dims = [(D_IN, H1), (H1, H2), (H2, H3), (H3, D_OUT)]
    params = {}
    for idx, (fan_in, fan_out) in enumerate(dims, start=1):
        key, kw, kb = jax.random.split(key, 3)
        bound = 1.0 / jnp.sqrt(fan_in)
        params[f"w{idx}"] = jax.random.uniform(
            kw, (fan_in, fan_out), jnp.float32, -bound, bound)
        params[f"b{idx}"] = jax.random.uniform(
            kb, (1, fan_out), jnp.float32, -bound, bound)
    return params


def reference_forward_matched(x, params, *, bf16_epilogue):
    """Pure-JAX reference matching the kernel's precision choices."""
    w1, b1 = params["w1"], params["b1"]
    h = jnp.maximum(x[:, 0:1] * w1[0:1, :] + x[:, 1:2] * w1[1:2, :] + b1, 0.0)
    h = h.astype(jnp.bfloat16)
    for i in (2, 3):
        acc = jnp.dot(h, params[f"w{i}"].astype(jnp.bfloat16),
                      preferred_element_type=jnp.float32)
        if bf16_epilogue:
            h = jnp.maximum(acc.astype(jnp.bfloat16)
                            + params[f"b{i}"].astype(jnp.bfloat16), 0)
        else:
            h = jnp.maximum(acc + params[f"b{i}"], 0.0).astype(jnp.bfloat16)
    return jnp.dot(h, params["w4"].astype(jnp.bfloat16),
                   preferred_element_type=jnp.float32) + params["b4"]


def reference_forward_f32(x, params):
    h = jnp.maximum(x @ params["w1"] + params["b1"], 0.0)
    h = jnp.maximum(h @ params["w2"] + params["b2"], 0.0)
    h = jnp.maximum(h @ params["w3"] + params["b3"], 0.0)
    return h @ params["w4"] + params["b4"]


if __name__ == "__main__":
    key = jax.random.PRNGKey(0)
    key, kx = jax.random.split(key)
    params = init_params(key)
    bf16_ep = _default_bf16_epilogue()

    # Small batch: exercises the padding path (8 rows -> one 256-row tile).
    x_small = jax.random.normal(kx, (8, D_IN), jnp.float32)
    out_small = jax.block_until_ready(embedding_net_forward(x_small, params))
    assert out_small.shape == (8, D_OUT), out_small.shape
    ref_small = reference_forward_matched(x_small, params, bf16_epilogue=bf16_ep)
    assert jnp.allclose(out_small, ref_small, atol=2e-2, rtol=2e-2), \
        "mismatch vs matched-precision reference (small batch)"
    assert jnp.allclose(out_small, reference_forward_f32(x_small, params),
                        atol=1e-1, rtol=1e-1), "mismatch vs f32 reference (small batch)"

    # Larger batch: multiple grid steps (4 tiles of 256) -> both TCs on v7x.
    key, kx2 = jax.random.split(key)
    x_big = jax.random.normal(kx2, (1024, D_IN), jnp.float32)
    out_big = jax.block_until_ready(embedding_net_forward(x_big, params))
    assert out_big.shape == (1024, D_OUT), out_big.shape
    ref_big = reference_forward_matched(x_big, params, bf16_epilogue=bf16_ep)
    assert jnp.allclose(out_big, ref_big, atol=2e-2, rtol=2e-2), \
        "mismatch vs matched-precision reference (large batch)"

    print("KERNEL_OK")
</pallas_src>

<mosaic_0001>
module attributes {stable_mosaic.version = 11 : i64} {
  func.func @_mlp_kernel(%arg0: i32, %arg1: memref<256x2xf32, #tpu.memory_space<vmem>>, %arg2: memref<2x128xf32, #tpu.memory_space<vmem>>, %arg3: memref<1x128xf32, #tpu.memory_space<vmem>>, %arg4: memref<128x256xbf16, #tpu.memory_space<vmem>>, %arg5: memref<1x256xbf16, #tpu.memory_space<vmem>>, %arg6: memref<256x128xbf16, #tpu.memory_space<vmem>>, %arg7: memref<1x128xbf16, #tpu.memory_space<vmem>>, %arg8: memref<128x64xbf16, #tpu.memory_space<vmem>>, %arg9: memref<1x64xf32, #tpu.memory_space<vmem>>, %arg10: memref<256x64xf32, #tpu.memory_space<vmem>>) attributes {dimension_semantics = [#tpu.dimension_semantics<parallel>], iteration_bounds = array<i64: 1>, scalar_prefetch = 0 : i64, scratch_operands = 0 : i64, tpu.core_type = #tpu.core_type<tc>, window_params = [{transform_indices = @transform_0, window_bounds = array<i64: 256, 2>}, {pipeline_mode = #tpu.pipeline_mode<synchronous>, transform_indices = @transform_1, window_bounds = array<i64: 2, 128>}, {pipeline_mode = #tpu.pipeline_mode<synchronous>, transform_indices = @transform_2, window_bounds = array<i64: 1, 128>}, {pipeline_mode = #tpu.pipeline_mode<synchronous>, transform_indices = @transform_3, window_bounds = array<i64: 128, 256>}, {pipeline_mode = #tpu.pipeline_mode<synchronous>, transform_indices = @transform_4, window_bounds = array<i64: 1, 256>}, {pipeline_mode = #tpu.pipeline_mode<synchronous>, transform_indices = @transform_5, window_bounds = array<i64: 256, 128>}, {pipeline_mode = #tpu.pipeline_mode<synchronous>, transform_indices = @transform_6, window_bounds = array<i64: 1, 128>}, {pipeline_mode = #tpu.pipeline_mode<synchronous>, transform_indices = @transform_7, window_bounds = array<i64: 128, 64>}, {pipeline_mode = #tpu.pipeline_mode<synchronous>, transform_indices = @transform_8, window_bounds = array<i64: 1, 64>}, {transform_indices = @transform_9, window_bounds = array<i64: 256, 64>}]} {
    %c0 = arith.constant 0 : index
    %c0_0 = arith.constant 0 : index
    %0 = vector.load %arg1[%c0, %c0_0] : memref<256x2xf32, #tpu.memory_space<vmem>>, vector<256x2xf32>
    %c0_1 = arith.constant 0 : index
    %c0_2 = arith.constant 0 : index
    %1 = vector.load %arg2[%c0_1, %c0_2] : memref<2x128xf32, #tpu.memory_space<vmem>>, vector<2x128xf32>
    %2 = vector.extract_strided_slice %0 {offsets = [0, 0], sizes = [256, 1], strides = [1, 1]} : vector<256x2xf32> to vector<256x1xf32>
    %3 = vector.extract_strided_slice %1 {offsets = [0, 0], sizes = [1, 128], strides = [1, 1]} : vector<2x128xf32> to vector<1x128xf32>
    %4 = vector.broadcast %2 : vector<256x1xf32> to vector<256x128xf32>
    %5 = vector.broadcast %3 : vector<1x128xf32> to vector<256x128xf32>
    %6 = arith.mulf %4, %5 : vector<256x128xf32>
    %7 = vector.extract_strided_slice %0 {offsets = [0, 1], sizes = [256, 1], strides = [1, 1]} : vector<256x2xf32> to vector<256x1xf32>
    %8 = vector.extract_strided_slice %1 {offsets = [1, 0], sizes = [1, 128], strides = [1, 1]} : vector<2x128xf32> to vector<1x128xf32>
    %9 = vector.broadcast %7 : vector<256x1xf32> to vector<256x128xf32>
    %10 = vector.broadcast %8 : vector<1x128xf32> to vector<256x128xf32>
    %11 = arith.mulf %9, %10 : vector<256x128xf32>
    %12 = arith.addf %6, %11 : vector<256x128xf32>
    %c0_3 = arith.constant 0 : index
    %c0_4 = arith.constant 0 : index
    %13 = vector.load %arg3[%c0_3, %c0_4] : memref<1x128xf32, #tpu.memory_space<vmem>>, vector<1x128xf32>
    %14 = vector.broadcast %13 : vector<1x128xf32> to vector<256x128xf32>
    %15 = arith.addf %12, %14 : vector<256x128xf32>
    %cst = arith.constant 0.000000e+00 : f32
    %16 = vector.broadcast %cst : f32 to vector<256x128xf32>
    %17 = arith.maximumf %15, %16 : vector<256x128xf32>
    %18 = arith.truncf %17 : vector<256x128xf32> to vector<256x128xbf16>
    %c0_5 = arith.constant 0 : index
    %c0_6 = arith.constant 0 : index
    %19 = vector.load %arg4[%c0_5, %c0_6] : memref<128x256xbf16, #tpu.memory_space<vmem>>, vector<128x256xbf16>
    %cst_7 = arith.constant dense<0.000000e+00> : vector<256x256xf32>
    %20 = tpu.matmul %18, %19, %cst_7 {dimension_numbers = #tpu.dot_dimension_numbers<[1], [0], [0], [1], [0, 0, 1, 1], [], []>} : vector<256x128xbf16>, vector<128x256xbf16>, vector<256x256xf32> -> vector<256x256xf32>
    %21 = arith.truncf %20 : vector<256x256xf32> to vector<256x256xbf16>
    %c0_8 = arith.constant 0 : index
    %c0_9 = arith.constant 0 : index
    %22 = vector.load %arg5[%c0_8, %c0_9] : memref<1x256xbf16, #tpu.memory_space<vmem>>, vector<1x256xbf16>
    %23 = vector.broadcast %22 : vector<1x256xbf16> to vector<256x256xbf16>
    %24 = arith.addf %21, %23 : vector<256x256xbf16>
    %cst_10 = arith.constant 0.000000e+00 : bf16
    %25 = vector.broadcast %cst_10 : bf16 to vector<256x256xbf16>
    %26 = arith.maximumf %24, %25 : vector<256x256xbf16>
    %c0_11 = arith.constant 0 : index
    %c0_12 = arith.constant 0 : index
    %27 = vector.load %arg6[%c0_11, %c0_12] : memref<256x128xbf16, #tpu.memory_space<vmem>>, vector<256x128xbf16>
    %cst_13 = arith.constant dense<0.000000e+00> : vector<256x128xf32>
    %28 = tpu.matmul %26, %27, %cst_13 {dimension_numbers = #tpu.dot_dimension_numbers<[1], [0], [0], [1], [0, 0, 1, 1], [], []>} : vector<256x256xbf16>, vector<256x128xbf16>, vector<256x128xf32> -> vector<256x128xf32>
    %29 = arith.truncf %28 : vector<256x128xf32> to vector<256x128xbf16>
    %c0_14 = arith.constant 0 : index
    %c0_15 = arith.constant 0 : index
    %30 = vector.load %arg7[%c0_14, %c0_15] : memref<1x128xbf16, #tpu.memory_space<vmem>>, vector<1x128xbf16>
    %31 = vector.broadcast %30 : vector<1x128xbf16> to vector<256x128xbf16>
    %32 = arith.addf %29, %31 : vector<256x128xbf16>
    %cst_16 = arith.constant 0.000000e+00 : bf16
    %33 = vector.broadcast %cst_16 : bf16 to vector<256x128xbf16>
    %34 = arith.maximumf %32, %33 : vector<256x128xbf16>
    %c0_17 = arith.constant 0 : index
    %c0_18 = arith.constant 0 : index
    %35 = vector.load %arg8[%c0_17, %c0_18] : memref<128x64xbf16, #tpu.memory_space<vmem>>, vector<128x64xbf16>
    %cst_19 = arith.constant dense<0.000000e+00> : vector<256x64xf32>
    %36 = tpu.matmul %34, %35, %cst_19 {dimension_numbers = #tpu.dot_dimension_numbers<[1], [0], [0], [1], [0, 0, 1, 1], [], []>} : vector<256x128xbf16>, vector<128x64xbf16>, vector<256x64xf32> -> vector<256x64xf32>
    %c0_20 = arith.constant 0 : index
    %c0_21 = arith.constant 0 : index
    %37 = vector.load %arg9[%c0_20, %c0_21] : memref<1x64xf32, #tpu.memory_space<vmem>>, vector<1x64xf32>
    %38 = vector.broadcast %37 : vector<1x64xf32> to vector<256x64xf32>
    %39 = arith.addf %36, %38 : vector<256x64xf32>
    %c0_22 = arith.constant 0 : index
    %c0_23 = arith.constant 0 : index
    %40 = vector.load %arg10[%c0_22, %c0_23] : memref<256x64xf32, #tpu.memory_space<vmem>>, vector<256x64xf32>
    tpu.vector_store %arg10[%c0_22, %c0_23], %39 {strides = array<i32>} : memref<256x64xf32, #tpu.memory_space<vmem>>, vector<256x64xf32>,
    return
  }
  func.func @transform_0(%arg0: i32) -> (i32, i32) {
    %c0_i32 = arith.constant 0 : i32
    %c0_i32_0 = arith.constant 0 : i32
    return %arg0, %c0_i32 : i32, i32
  }
  func.func @transform_1(%arg0: i32) -> (i32, i32) {
    %c0_i32 = arith.constant 0 : i32
    %c0_i32_0 = arith.constant 0 : i32
    %c0_i32_1 = arith.constant 0 : i32
    return %c0_i32, %c0_i32_0 : i32, i32
  }
  func.func @transform_2(%arg0: i32) -> (i32, i32) {
    %c0_i32 = arith.constant 0 : i32
    %c0_i32_0 = arith.constant 0 : i32
    %c0_i32_1 = arith.constant 0 : i32
    return %c0_i32, %c0_i32_0 : i32, i32
  }
  func.func @transform_3(%arg0: i32) -> (i32, i32) {
    %c0_i32 = arith.constant 0 : i32
    %c0_i32_0 = arith.constant 0 : i32
    %c0_i32_1 = arith.constant 0 : i32
    return %c0_i32, %c0_i32_0 : i32, i32
  }
  func.func @transform_4(%arg0: i32) -> (i32, i32) {
    %c0_i32 = arith.constant 0 : i32
    %c0_i32_0 = arith.constant 0 : i32
    %c0_i32_1 = arith.constant 0 : i32
    return %c0_i32, %c0_i32_0 : i32, i32
  }
  func.func @transform_5(%arg0: i32) -> (i32, i32) {
    %c0_i32 = arith.constant 0 : i32
    %c0_i32_0 = arith.constant 0 : i32
    %c0_i32_1 = arith.constant 0 : i32
    return %c0_i32, %c0_i32_0 : i32, i32
  }
  func.func @transform_6(%arg0: i32) -> (i32, i32) {
    %c0_i32 = arith.constant 0 : i32
    %c0_i32_0 = arith.constant 0 : i32
    %c0_i32_1 = arith.constant 0 : i32
    return %c0_i32, %c0_i32_0 : i32, i32
  }
  func.func @transform_7(%arg0: i32) -> (i32, i32) {
    %c0_i32 = arith.constant 0 : i32
    %c0_i32_0 = arith.constant 0 : i32
    %c0_i32_1 = arith.constant 0 : i32
    return %c0_i32, %c0_i32_0 : i32, i32
  }
  func.func @transform_8(%arg0: i32) -> (i32, i32) {
    %c0_i32 = arith.constant 0 : i32
    %c0_i32_0 = arith.constant 0 : i32
    %c0_i32_1 = arith.constant 0 : i32
    return %c0_i32, %c0_i32_0 : i32, i32
  }
  func.func @transform_9(%arg0: i32) -> (i32, i32) {
    %c0_i32 = arith.constant 0 : i32
    %c0_i32_0 = arith.constant 0 : i32
    return %arg0, %c0_i32 : i32, i32
  }
}

</mosaic_0001>

<bundles_post_ra>
// kernel: tpu_custom_call.1
= control target key start
LH: loop header
LB: loop body
LE: loop exit
PB: predicated region body
PF: predicated region fallthrough
CT: control target
= control target key end

     0   :  { %v1917_v0 = vmov 1   ;;  %v1918_v1 = vmov 0   ;;  %v226_v45 = vlaneseq  ;;  %vm1545_vm0 = vcmask 523264   ;;  %s2643_s0 = inlined_call_operand.vmem [shape: f32[256,2], index: 0, kind: input, shape index: {}]   ;;  %s2644_s3 = inlined_call_operand.vmem [shape: bf16[128,256], index: 3, kind: input, shape index: {}]   ;;  %s2645_s1 = inlined_call_operand.vmem [shape: f32[2,128], index: 1, kind: input, shape index: {}]   ;;  %s2646_s2 = inlined_call_operand.vmem [shape: f32[1,128], index: 2, kind: input, shape index: {}]   ;;  %s2647_s5 = inlined_call_operand.vmem [shape: bf16[256,128], index: 5, kind: input, shape index: {}]   ;;  %s2648_s4 = inlined_call_operand.vmem [shape: bf16[1,256], index: 4, kind: input, shape index: {}]   ;;  %s2649_s7 = inlined_call_operand.vmem [shape: bf16[128,64], index: 7, kind: input, shape index: {}]   ;;  %s2650_s6 = inlined_call_operand.vmem [shape: bf16[1,128], index: 6, kind: input, shape index: {}]   ;;  %s2651_s8 = inlined_call_operand.vmem [shape: f32[1,64], index: 8, kind: input, shape index: {}]   ;;  %s2652_s9 = inlined_call_operand.vmem [shape: f32[256,64], index: 9, kind: output, shape index: {}]  }
   0x1   :  { %1829 = vset.pattern.permute.xlu1 %v1917_v0  ;;  %1828 = vset.pattern.permute.xlu0 %v1918_v1  ;;  %v33_v2 = vld [vmem:[%s2643_s0] sm:$0xff]  ;;  %v34_v3 = vld [vmem:[%s2643_s0 + $0x8] sm:$0xff]  ;;  %v36_v4 = vld [vmem:[%s2643_s0 + $0x18] sm:$0xff] }
   0x2   :  { %263 = vperm.xlu1 %1829, %v33_v2   ;;  %68 = vperm.xlu0 %1828, %v33_v2   ;;  %v35_v5 = vld [vmem:[%s2643_s0 + $0x10] sm:$0xff]  ;;  %v1869_v6 = vld [vmem:[%s2644_s3 + $0x4] ss:$8 sps:$4 sm:$0xff]   ;;  %v1871_v7 = vld [vmem:[%s2644_s3] ss:$8 sps:$4 sm:$0xff]   ;;  %v2137_v46 = vshrl.u32 %v226_v45, 7 }
   0x3   :  { %673 = vmatprep.mubr.bf16.mxu0 %v1918_v1  ;;  %793 = vmatprep.mubr.bf16.mxu1 %v1918_v1  ;;  %v1872_v8 = vld [vmem:[%s2644_s3 + $0x14] ss:$8 sps:$4 sm:$0xff]   ;;  %v1874_v9 = vld [vmem:[%s2644_s3 + $0x10] ss:$8 sps:$4 sm:$0xff]   ;;  %v1875_v10 = vld [vmem:[%s2644_s3 + $0x24] ss:$8 sps:$4 sm:$0xff]  }
   0x4   :  { %641 = vmatprep.subr.bf16.mxu0 %v1869_v6  ;;  %1809 = vmatprep.subr.bf16.mxu1 %v1869_v6  ;;  %v39_v11 = vld [vmem:[%s2643_s0 + $0x30] sm:$0xff]  ;;  %v1877_v12 = vld [vmem:[%s2644_s3 + $0x20] ss:$8 sps:$4 sm:$0xff]   ;;  %v1881_v17 = vld [vmem:[%s2644_s3 + $0x44] ss:$8 sps:$4 sm:$0xff]   ;;  %v392_v47 = vsub.s32 1, %v2137_v46 }
   0x5   :  { %642 = vmatpush1.bf16.msra.mxu0 %v1871_v7  ;;  %1817 = vmatpush1.bf16.msra.mxu1 %v1871_v7  ;;  %v1878_v13 = vld [vmem:[%s2644_s3 + $0x34] ss:$8 sps:$4 sm:$0xff]   ;;  %v37_v14 = vld [vmem:[%s2643_s0 + $0x20] sm:$0xff]  ;;  %v1880_v15 = vld [vmem:[%s2644_s3 + $0x30] ss:$8 sps:$4 sm:$0xff]   ;;  %v2142_v48 = vsub.s32 0, %v2137_v46 }
   0x6   :  { %267 = vperm.xlu1 %1829, %v34_v3   ;;  %73 = vperm.xlu0 %1828, %v34_v3   ;;  %v38_v16 = vld [vmem:[%s2643_s0 + $0x28] sm:$0xff]  ;;  %v1884_v19 = vld [vmem:[%s2644_s3 + $0x54] ss:$8 sps:$4 sm:$0xff]   ;;  %v1886_v20 = vld [vmem:[%s2644_s3 + $0x50] ss:$8 sps:$4 sm:$0xff]  }
   0x7   :  { %643 = vmatprep.subr.bf16.mxu0 %v1872_v8  ;;  %1810 = vmatprep.subr.bf16.mxu1 %v1872_v8  ;;  %v1883_v18 = vld [vmem:[%s2644_s3 + $0x40] ss:$8 sps:$4 sm:$0xff]   ;;  %v1887_v22 = vld [vmem:[%s2644_s3 + $0x64] ss:$8 sps:$4 sm:$0xff]   ;;  %v40_v23 = vld [vmem:[%s2643_s0 + $0x38] sm:$0xff] }
   0x8   :  { %v42_v21 = vld [vmem:[%s2643_s0 + $0x48] sm:$0xff]  ;;  %v43_v25 = vld [vmem:[%s2643_s0 + $0x50] sm:$0xff]  ;;  %v41_v28 = vld [vmem:[%s2643_s0 + $0x40] sm:$0xff] }
   0x9   :  { %644 = vmatpush1.bf16.msra.mxu0 %v1874_v9  ;;  %1818 = vmatpush1.bf16.msra.mxu1 %v1874_v9  ;;  %v1889_v24 = vld [vmem:[%s2644_s3 + $0x60] ss:$8 sps:$4 sm:$0xff]   ;;  %v1890_v26 = vld [vmem:[%s2644_s3 + $0x74] ss:$8 sps:$4 sm:$0xff]   ;;  %v1892_v27 = vld [vmem:[%s2644_s3 + $0x70] ss:$8 sps:$4 sm:$0xff]  }
   0xa   :  { %1830 = vset.pattern.permute.xlu1 %v1918_v1  ;;  %78 = vperm.xlu0 %1828, %v35_v5   ;;  %v47_v29 = vld [vmem:[%s2643_s0 + $0x70] sm:$0xff]  ;;  %v46_v30 = vld [vmem:[%s2643_s0 + $0x68] sm:$0xff]  ;;  %v44_v32 = vld [vmem:[%s2643_s0 + $0x58] sm:$0xff] }
   0xb   :  { %83 = vperm.xlu1 %1830, %v36_v4   ;;  %645 = vmatprep.subr.bf16.mxu0 %v1875_v10  ;;  %v50_v31 = vld [vmem:[%s2643_s0 + $0x88] sm:$0xff]  ;;  %v51_v33 = vld [vmem:[%s2643_s0 + $0x90] sm:$0xff]  ;;  %v45_v34 = vld [vmem:[%s2643_s0 + $0x60] sm:$0xff] }
   0xc   :  { %1811 = vmatprep.subr.bf16.mxu1 %v1875_v10  ;;  %v55_v35 = vld [vmem:[%s2643_s0 + $0xb0] sm:$0xff]  ;;  %v54_v36 = vld [vmem:[%s2643_s0 + $0xa8] sm:$0xff]  ;;  %v48_v37 = vld [vmem:[%s2643_s0 + $0x78] sm:$0xff] }
   0xd   :  { %646 = vmatpush1.bf16.msra.mxu0 %v1877_v12  ;;  %1819 = vmatpush1.bf16.msra.mxu1 %v1877_v12  ;;  %v2103_v38 = vld [vmem:[%s2643_s0 + $0xc8] sm:$0xff]  ;;  %v59_v39 = vld [vmem:[%s2643_s0 + $0xd0] sm:$0xff]  ;;  %v49_v40 = vld [vmem:[%s2643_s0 + $0x80] sm:$0xff] }
   0xe   :  { %1831 = vset.pattern.permute.xlu0 %v1917_v0  ;;  %647 = vmatprep.subr.bf16.mxu0 %v1878_v13  ;;  %v2120_v41 = vld [vmem:[%s2643_s0 + $0xe8] sm:$0xff]  ;;  %v63_v42 = vld [vmem:[%s2643_s0 + $0xf0] sm:$0xff]  ;;  %v52_v43 = vld [vmem:[%s2643_s0 + $0x98] sm:$0xff] }
   0xf   :  { %1832 = vset.pattern.permute.xlu1 %v1917_v0  ;;  %271 = vperm.xlu0 %1831, %v35_v5   ;;  %v53_v44 = vld [vmem:[%s2643_s0 + $0xa0] sm:$0xff]  ;;  %v56_v52 = vld [vmem:[%s2643_s0 + $0xb8] sm:$0xff] }
  0x10   :  { %275 = vperm.xlu1 %1832, %v36_v4   ;;  %1812 = vmatprep.subr.bf16.mxu1 %v1878_v13  ;;  %v65_v49 = vld [vmem:[%s2645_s1] sm:$0x3] }
  0x11   :  { %648 = vmatpush1.bf16.msra.mxu0 %v1880_v15  ;;  %1820 = vmatpush1.bf16.msra.mxu1 %v1880_v15  ;;  %v2147_v50 = vrot.slane %v65_v49, %v392_v47  ;;  %v2150_v51 = vrot.slane %v65_v49, %v2142_v48  ;;  %v2161_v58 = vld [vmem:[%s2646_s2] ss:$0 sm:$0xff] }
  0x12   :  { %649 = vmatprep.subr.bf16.mxu0 %v1881_v17  ;;  %1813 = vmatprep.subr.bf16.mxu1 %v1881_v17  ;;  %v57_v6 = vld [vmem:[%s2643_s0 + $0xc0] sm:$0xff] }
  0x13   :  { %287 = vperm.xlu0 %1831, %v39_v11  }
  0x14   :  { %1833 = vset.pattern.permute.xlu1 %v1918_v1 }
  0x15   :  { %88 = vperm.xlu1 %1833, %v37_v14   ;;  %650 = vmatpush1.bf16.msra.mxu0 %v1883_v18 }
  0x16   :  { %651 = vmatprep.subr.bf16.mxu0 %v1884_v19  ;;  %1821 = vmatpush1.bf16.msra.mxu1 %v1883_v18 }
  0x17   :  { %1836 = vset.pattern.permute.xlu0 %v1918_v1  ;;  %1814 = vmatprep.subr.bf16.mxu1 %v1884_v19 }
  0x18   :  { %93 = vperm.xlu0 %1836, %v38_v16  }
  0x19   :  { %1834 = vset.pattern.permute.xlu1 %v1917_v0  ;;  %652 = vmatpush1.bf16.msra.mxu0 %v1886_v20 }
  0x1a   :  { %279 = vperm.xlu1 %1834, %v37_v14   ;;  %653 = vmatprep.subr.bf16.mxu0 %v1887_v22 }
  0x1b   :  { %1822 = vmatpush1.bf16.msra.mxu1 %v1886_v20 }
  0x1c   :  { %98 = vperm.xlu0 %1836, %v39_v11   ;;  %1815 = vmatprep.subr.bf16.mxu1 %v1887_v22 }
  0x1d   :  { %654 = vmatpush1.bf16.msra.mxu0 %v1889_v24 }
  0x1e   :  { %283 = vperm.xlu1 %1834, %v38_v16   ;;  %655 = vmatprep.subr.bf16.mxu0 %v1890_v26 }
  0x1f   :  { %1823 = vmatpush1.bf16.msra.mxu1 %v1889_v24 }
  0x20   :  { %113 = vperm.xlu0 %1836, %v42_v21   ;;  %1816 = vmatprep.subr.bf16.mxu1 %v1890_v26 }
  0x21   :  { %656 = vmatpush1.bf16.msra.mxu0 %v1892_v27 }
  0x22   :  { %1835 = vset.pattern.permute.xlu1 %v1918_v1 }
  0x23   :  { %103 = vperm.xlu1 %1835, %v40_v23   ;;  %1824 = vmatpush1.bf16.msra.mxu1 %v1892_v27 }
  0x24   :  { %118 = vperm.xlu0 %1836, %v43_v25  }
  0x27   :  { %1837 = vset.pattern.permute.xlu1 %v1917_v0 }
  0x28   :  { %291 = vperm.xlu1 %1837, %v40_v23   ;;  %1841 = vset.pattern.permute.xlu0 %v1917_v0 }
  0x29   :  { %303 = vperm.xlu0 %1841, %v43_v25   ;;  %v60_v25 = vld [vmem:[%s2643_s0 + $0xd8] sm:$0xff] }
  0x2c   :  { %1838 = vset.pattern.permute.xlu1 %v1918_v1 }
  0x2d   :  { %108 = vperm.xlu1 %1838, %v41_v28   ;;  %319 = vperm.xlu0 %1841, %v47_v29  }
  0x31   :  { %1839 = vset.pattern.permute.xlu1 %v1917_v0  ;;  %1846 = vset.pattern.permute.xlu0 %v1918_v1 }
  0x32   :  { %295 = vperm.xlu1 %1839, %v41_v28   ;;  %133 = vperm.xlu0 %1846, %v46_v30  }
  0x36   :  { %299 = vperm.xlu1 %1839, %v42_v21   ;;  %138 = vperm.xlu0 %1846, %v47_v29  }
  0x3a   :  { %1840 = vset.pattern.permute.xlu1 %v1918_v1  ;;  %153 = vperm.xlu0 %1846, %v50_v31  }
  0x3b   :  { %123 = vperm.xlu1 %1840, %v44_v32  }
  0x3e   :  { %158 = vperm.xlu0 %1846, %v51_v33  }
  0x3f   :  { %1842 = vset.pattern.permute.xlu1 %v1917_v0 }
  0x40   :  { %307 = vperm.xlu1 %1842, %v44_v32  }
  0x42   :  { %1851 = vset.pattern.permute.xlu0 %v1917_v0 }
  0x43   :  { %335 = vperm.xlu0 %1851, %v51_v33  }
  0x44   :  { %1843 = vset.pattern.permute.xlu1 %v1918_v1 }
  0x45   :  { %128 = vperm.xlu1 %1843, %v45_v34  }
  0x47   :  { %351 = vperm.xlu0 %1851, %v55_v35  }
  0x49   :  { %1844 = vset.pattern.permute.xlu1 %v1917_v0 }
  0x4a   :  { %311 = vperm.xlu1 %1844, %v45_v34  }
  0x4b   :  { %1856 = vset.pattern.permute.xlu0 %v1918_v1 }
  0x4c   :  { %173 = vperm.xlu0 %1856, %v54_v36  }
  0x4e   :  { %315 = vperm.xlu1 %1844, %v46_v30  }
  0x50   :  { %178 = vperm.xlu0 %1856, %v55_v35  }
  0x52   :  { %1845 = vset.pattern.permute.xlu1 %v1918_v1 }
  0x53   :  { %143 = vperm.xlu1 %1845, %v48_v37  }
  0x54   :  { %193 = vperm.xlu0 %1856, %v2103_v38  }
  0x57   :  { %1847 = vset.pattern.permute.xlu1 %v1917_v0 }
  0x58   :  { %323 = vperm.xlu1 %1847, %v48_v37   ;;  %1861 = vset.pattern.permute.xlu0 %v1917_v0 }
  0x59   :  { %367 = vperm.xlu0 %1861, %v59_v39  }
  0x5c   :  { %1848 = vset.pattern.permute.xlu1 %v1918_v1 }
  0x5d   :  { %148 = vperm.xlu1 %1848, %v49_v40   ;;  %1862 = vset.pattern.permute.xlu0 %v1918_v1 }
  0x5e   :  { %198 = vperm.xlu0 %1862, %v59_v39  }
  0x61   :  { %1849 = vset.pattern.permute.xlu1 %v1917_v0 }
  0x62   :  { %327 = vperm.xlu1 %1849, %v49_v40   ;;  %213 = vperm.xlu0 %1862, %v2120_v41  }
  0x66   :  { %331 = vperm.xlu1 %1849, %v50_v31   ;;  %218 = vperm.xlu0 %1862, %v63_v42  }
  0x6a   :  { %1850 = vset.pattern.permute.xlu1 %v1918_v1  ;;  %1867 = vset.pattern.permute.xlu0 %v1917_v0 }
  0x6b   :  { %163 = vperm.xlu1 %1850, %v52_v43   ;;  %383 = vperm.xlu0 %1867, %v63_v42   ;;  %v61_v42 = vld [vmem:[%s2643_s0 + $0xe0] sm:$0xff] }
  0x6f   :  { %1852 = vset.pattern.permute.xlu1 %v1917_v0 }
  0x70   :  { %339 = vperm.xlu1 %1852, %v52_v43  }
  0x74   :  { %1853 = vset.pattern.permute.xlu1 %v1918_v1 }
  0x75   :  { %168 = vperm.xlu1 %1853, %v53_v44  }
  0x79   :  { %1854 = vset.pattern.permute.xlu1 %v1917_v0 }
  0x7a   :  { %343 = vperm.xlu1 %1854, %v53_v44  }
  0x7e   :  { %347 = vperm.xlu1 %1854, %v54_v36  }
  0x81   :  { %v264_v53 = vpop.permute.xlu1 %263  ;;  %v69_v54 = vpop.permute.xlu0 %68 }
  0x82   :  { %v394_v55 = vmul.f32 %v2147_v50, %v264_v53  ;;  %v230_v56 = vmul.f32 %v2150_v51, %v69_v54  ;;  %1855 = vset.pattern.permute.xlu1 %v1918_v1 }
  0x83   :  { %183 = vperm.xlu1 %1855, %v56_v52  }
  0x84   :  { %v426_v57 = vadd.f32 %v394_v55, %v230_v56 }
  0x85   :  { %v268_v59 = vpop.permute.xlu1 %267  ;;  %v74_v60 = vpop.permute.xlu0 %73 }
  0x86   :  { %v395_v61 = vmul.f32 %v2147_v50, %v268_v59  ;;  %v231_v62 = vmul.f32 %v2150_v51, %v74_v60  ;;  %v465_v63 = vadd.f32 %v2161_v58, %v426_v57 }
  0x87   :  { %1857 = vset.pattern.permute.xlu1 %v1917_v0 }
  0x88   :  { %v427_v2 = vadd.f32 %v395_v61, %v231_v62  ;;  %355 = vperm.xlu1 %1857, %v56_v52   ;;  %v497_v7 = vmax.f32 %v465_v63, 0.0 }
  0x89   :  { %v79_v3 = vpop.permute.xlu0 %78 }
  0x8a   :  { %v466_v4 = vadd.f32 %v2161_v58, %v427_v2  ;;  %v84_v5 = vpop.permute.xlu1 %83  ;;  %v232_v9 = vmul.f32 %v2150_v51, %v79_v3  ;;  %v64_v2 = vld [vmem:[%s2643_s0 + $0xf8] sm:$0xff] }
  0x8b   :  { %v233_v14 = vmul.f32 %v2150_v51, %v84_v5 }
  0x8c   :  { %v498_v8 = vmax.f32 %v466_v4, 0.0  ;;  %1858 = vset.pattern.permute.xlu1 %v1918_v1 }
  0x8d   :  { %188 = vperm.xlu1 %1858, %v57_v6  }
  0x8e   :  { %v272_v10 = vpop.permute.xlu0 %271  ;;  %v529_v11 = vpack.c.bf16 %v498_v8, %v497_v7 }
  0x8f   :  { %v276_v12 = vpop.permute.xlu1 %275  ;;  %v396_v13 = vmul.f32 %v2147_v50, %v272_v10 }
  0x90   :  { %v397_v15 = vmul.f32 %v2147_v50, %v276_v12  ;;  %674 = vmatmul.mubr.bf16.vlgmr.msra.gmra.mrb[0].mxu0 %v529_v11 }
  0x91   :  { %v428_v16 = vadd.f32 %v396_v13, %v232_v9  ;;  %1859 = vset.pattern.permute.xlu1 %v1917_v0  ;;  %683 = vmatprep.mubr.bf16.mxu0 %v1918_v1 }
  0x92   :  { %v429_v17 = vadd.f32 %v397_v15, %v233_v14  ;;  %359 = vperm.xlu1 %1859, %v57_v6   ;;  %v288_v19 = vpop.permute.xlu0 %287 }
  0x93   :  { %v467_v18 = vadd.f32 %v2161_v58, %v428_v16  ;;  %v400_v36 = vmul.f32 %v2147_v50, %v288_v19 }
  0x94   :  { %v468_v20 = vadd.f32 %v2161_v58, %v429_v17  ;;  %v89_v21 = vpop.permute.xlu1 %88 }
  0x95   :  { %v499_v22 = vmax.f32 %v467_v18, 0.0  ;;  %v234_v28 = vmul.f32 %v2150_v51, %v89_v21 }
  0x96   :  { %v500_v23 = vmax.f32 %v468_v20, 0.0  ;;  %363 = vperm.xlu1 %1859, %v2103_v38  }
  0x97   :  { %v94_v27 = vpop.permute.xlu0 %93 }
  0x98   :  { %v530_v24 = vpack.c.bf16 %v500_v23, %v499_v22  ;;  %v235_v31 = vmul.f32 %v2150_v51, %v94_v27 }
  0x99   :  { %v280_v26 = vpop.permute.xlu1 %279 }
  0x9a   :  { %v398_v29 = vmul.f32 %v2147_v50, %v280_v26  ;;  %1860 = vset.pattern.permute.xlu1 %v1918_v1  ;;  %684 = vmatmul.mubr.bf16.gmra.mrb[4].mxu0 %v530_v24 }
  0x9b   :  { %203 = vperm.xlu1 %1860, %v60_v25   ;;  %693 = vmatprep.mubr.bf16.mxu0 %v1918_v1  ;;  %v99_v33 = vpop.permute.xlu0 %98 }
  0x9c   :  { %v430_v30 = vadd.f32 %v398_v29, %v234_v28  ;;  %v236_v38 = vmul.f32 %v2150_v51, %v99_v33 }
  0x9d   :  { %v284_v32 = vpop.permute.xlu1 %283 }
  0x9e   :  { %v399_v34 = vmul.f32 %v2147_v50, %v284_v32  ;;  %v469_v35 = vadd.f32 %v2161_v58, %v430_v30  ;;  %v432_v45 = vadd.f32 %v400_v36, %v236_v38 }
  0x9f   :  { %1863 = vset.pattern.permute.xlu1 %v1917_v0  ;;  %v114_v56 = vpop.permute.xlu0 %113 }
  0xa0   :  { %v431_v37 = vadd.f32 %v399_v34, %v235_v31  ;;  %371 = vperm.xlu1 %1863, %v60_v25   ;;  %v501_v43 = vmax.f32 %v469_v35, 0.0  ;;  %v471_v54 = vadd.f32 %v2161_v58, %v432_v45  ;;  %v1893_v25 = vld [vmem:[%s2647_s5 + $0x40] sm:$0xff]  }
  0xa1   :  { %1625 = vmatprep.subr.bf16.mxu1 %v1893_v25 }
  0xa2   :  { %v470_v39 = vadd.f32 %v2161_v58, %v431_v37  ;;  %v104_v40 = vpop.permute.xlu1 %103  ;;  %v503_v59 = vmax.f32 %v471_v54, 0.0 }
  0xa3   :  { %v237_v52 = vmul.f32 %v2150_v51, %v104_v40  ;;  %v119_v62 = vpop.permute.xlu0 %118 }
  0xa4   :  { %v502_v44 = vmax.f32 %v470_v39, 0.0  ;;  %1864 = vset.pattern.permute.xlu1 %v1918_v1  ;;  %v240_v12 = vmul.f32 %v2150_v51, %v119_v62 }
  0xa5   :  { %208 = vperm.xlu1 %1864, %v61_v42  }
  0xa6   :  { %v531_v47 = vpack.c.bf16 %v502_v44, %v501_v43 }
  0xa7   :  { %v292_v49 = vpop.permute.xlu1 %291 }
  0xa8   :  { %v401_v53 = vmul.f32 %v2147_v50, %v292_v49  ;;  %694 = vmatmul.mubr.bf16.gmra.mrb[8].mxu0 %v531_v47  ;;  %v304_v8 = vpop.permute.xlu0 %303 }
  0xa9   :  { %1865 = vset.pattern.permute.xlu1 %v1917_v0  ;;  %703 = vmatprep.mubr.bf16.mxu0 %v1918_v1  ;;  %v404_v13 = vmul.f32 %v2147_v50, %v304_v8 }
  0xaa   :  { %v433_v55 = vadd.f32 %v401_v53, %v237_v52  ;;  %375 = vperm.xlu1 %1865, %v61_v42  }
  0xab   :  { %v436_v18 = vadd.f32 %v404_v13, %v240_v12 }
  0xac   :  { %v472_v57 = vadd.f32 %v2161_v58, %v433_v55  ;;  %v109_v60 = vpop.permute.xlu1 %108  ;;  %v320_v24 = vpop.permute.xlu0 %319 }
  0xad   :  { %v238_v4 = vmul.f32 %v2150_v51, %v109_v60  ;;  %v475_v22 = vadd.f32 %v2161_v58, %v436_v18  ;;  %v408_v42 = vmul.f32 %v2147_v50, %v320_v24 }
  0xae   :  { %v504_v61 = vmax.f32 %v472_v57, 0.0  ;;  %379 = vperm.xlu1 %1865, %v2120_v41   ;;  %v239_v41 = vmul.f32 %v2150_v51, %v114_v56 }
  0xaf   :  { %v507_v27 = vmax.f32 %v475_v22, 0.0 }
  0xb0   :  { %v532_v63 = vpack.c.bf16 %v504_v61, %v503_v59 }
  0xb1   :  { %v296_v3 = vpop.permute.xlu1 %295  ;;  %v134_v32 = vpop.permute.xlu0 %133 }
  0xb2   :  { %v402_v5 = vmul.f32 %v2147_v50, %v296_v3  ;;  %1866 = vset.pattern.permute.xlu1 %v1918_v1  ;;  %704 = vmatmul.mubr.bf16.gmra.mrb[12].mxu0 %v532_v63  ;;  %v243_v36 = vmul.f32 %v2150_v51, %v134_v32 }
  0xb3   :  { %223 = vperm.xlu1 %1866, %v64_v2   ;;  %713 = vmatprep.mubr.bf16.mxu0 %v1918_v1 }
  0xb4   :  { %v434_v6 = vadd.f32 %v402_v5, %v238_v4 }
  0xb5   :  { %v300_v7 = vpop.permute.xlu1 %299  ;;  %v139_v38 = vpop.permute.xlu0 %138 }
  0xb6   :  { %v403_v9 = vmul.f32 %v2147_v50, %v300_v7  ;;  %v473_v10 = vadd.f32 %v2161_v58, %v434_v6  ;;  %v244_v44 = vmul.f32 %v2150_v51, %v139_v38 }
  0xb7   :  { %1868 = vset.pattern.permute.xlu1 %v1917_v0 }
  0xb8   :  { %v435_v11 = vadd.f32 %v403_v9, %v239_v41  ;;  %387 = vperm.xlu1 %1868, %v64_v2   ;;  %v505_v16 = vmax.f32 %v473_v10, 0.0  ;;  %v440_v53 = vadd.f32 %v408_v42, %v244_v44 }
  0xb9   :  { %v154_v61 = vpop.permute.xlu0 %153 }
  0xba   :  { %v474_v14 = vadd.f32 %v2161_v58, %v435_v11  ;;  %v124_v15 = vpop.permute.xlu1 %123  ;;  %v479_v59 = vadd.f32 %v2161_v58, %v440_v53  ;;  %v247_v9 = vmul.f32 %v2150_v51, %v154_v61 }
  0xbb   :  { %v241_v21 = vmul.f32 %v2150_v51, %v124_v15 }
  0xbc   :  { %v506_v17 = vmax.f32 %v474_v14, 0.0  ;;  %v511_v63 = vmax.f32 %v479_v59, 0.0 }
  0xbd   :  { %v159_v4 = vpop.permute.xlu0 %158 }
  0xbe   :  { %v533_v19 = vpack.c.bf16 %v506_v17, %v505_v16  ;;  %v248_v15 = vmul.f32 %v2150_v51, %v159_v4 }
  0xbf   :  { %v308_v20 = vpop.permute.xlu1 %307 }
  0xc0   :  { %v405_v0 = vmul.f32 %v2147_v50, %v308_v20  ;;  %714 = vmatmul.mubr.bf16.gmra.mrb[16].mxu0 %v533_v19 }
  0xc1   :  { %723 = vmatprep.mubr.bf16.mxu0 %v1918_v1 }
  0xc2   :  { %v437_v23 = vadd.f32 %v405_v0, %v241_v21  ;;  %v336_v11 = vpop.permute.xlu0 %335 }
  0xc3   :  { %v412_v16 = vmul.f32 %v2147_v50, %v336_v11 }
  0xc4   :  { %v476_v26 = vadd.f32 %v2161_v58, %v437_v23  ;;  %v129_v28 = vpop.permute.xlu1 %128 }
  0xc5   :  { %v242_v33 = vmul.f32 %v2150_v51, %v129_v28  ;;  %v444_v21 = vadd.f32 %v412_v16, %v248_v15 }
  0xc6   :  { %v508_v29 = vmax.f32 %v476_v26, 0.0 }
  0xc7   :  { %v483_v25 = vadd.f32 %v2161_v58, %v444_v21 }
  0xc8   :  { %v534_v30 = vpack.c.bf16 %v508_v29, %v507_v27  ;;  %v352_v27 = vpop.permute.xlu0 %351 }
  0xc9   :  { %v312_v31 = vpop.permute.xlu1 %311  ;;  %v515_v29 = vmax.f32 %v483_v25, 0.0  ;;  %v416_v44 = vmul.f32 %v2147_v50, %v352_v27  ;;  %v1895_v25 = vld [vmem:[%s2647_s5 + $0x48] sm:$0xff]  }
  0xca   :  { %v406_v34 = vmul.f32 %v2147_v50, %v312_v31  ;;  %724 = vmatmul.mubr.bf16.gmra.mrb[20].mxu0 %v534_v30 }
  0xcb   :  { %733 = vmatprep.mubr.bf16.mxu0 %v1918_v1 }
  0xcc   :  { %v438_v35 = vadd.f32 %v406_v34, %v242_v33  ;;  %v174_v34 = vpop.permute.xlu0 %173 }
  0xcd   :  { %v316_v37 = vpop.permute.xlu1 %315  ;;  %v251_v38 = vmul.f32 %v2150_v51, %v174_v34 }
  0xce   :  { %v407_v39 = vmul.f32 %v2147_v50, %v316_v37  ;;  %v477_v40 = vadd.f32 %v2161_v58, %v438_v35 }
  0xd0   :  { %v439_v43 = vadd.f32 %v407_v39, %v243_v36  ;;  %v509_v49 = vmax.f32 %v477_v40, 0.0  ;;  %v179_v40 = vpop.permute.xlu0 %178 }
  0xd2   :  { %v478_v45 = vadd.f32 %v2161_v58, %v439_v43  ;;  %v144_v47 = vpop.permute.xlu1 %143 }
  0xd3   :  { %v245_v56 = vmul.f32 %v2150_v51, %v144_v47  ;;  %v252_v47 = vmul.f32 %v2150_v51, %v179_v40 }
  0xd4   :  { %v510_v52 = vmax.f32 %v478_v45, 0.0  ;;  %v194_v4 = vpop.permute.xlu0 %193 }
  0xd6   :  { %v535_v54 = vpack.c.bf16 %v510_v52, %v509_v49 }
  0xd7   :  { %v324_v55 = vpop.permute.xlu1 %323 }
  0xd8   :  { %v409_v57 = vmul.f32 %v2147_v50, %v324_v55  ;;  %734 = vmatmul.mubr.bf16.gmra.mrb[24].mxu0 %v535_v54  ;;  %v448_v55 = vadd.f32 %v416_v44, %v252_v47  ;;  %v1900_v44 = vld [vmem:[%s2647_s5 + $0x18] sm:$0xff]  }
  0xd9   :  { %743 = vmatprep.mubr.bf16.mxu0 %v1918_v1 }
  0xda   :  { %v441_v60 = vadd.f32 %v409_v57, %v245_v56 }
  0xdc   :  { %v480_v62 = vadd.f32 %v2161_v58, %v441_v60  ;;  %v149_v2 = vpop.permute.xlu1 %148  ;;  %v487_v60 = vadd.f32 %v2161_v58, %v448_v55 }
  0xdd   :  { %v246_v41 = vmul.f32 %v2150_v51, %v149_v2 }
  0xde   :  { %v512_v3 = vmax.f32 %v480_v62, 0.0 }
  0xe0   :  { %v536_v5 = vpack.c.bf16 %v512_v3, %v511_v63  ;;  %v519_v63 = vmax.f32 %v487_v60, 0.0 }
  0xe1   :  { %v328_v6 = vpop.permute.xlu1 %327 }
  0xe2   :  { %v410_v7 = vmul.f32 %v2147_v50, %v328_v6  ;;  %744 = vmatmul.mubr.bf16.gmra.mrb[28].mxu0 %v536_v5 }
  0xe3   :  { %753 = vmatprep.mubr.bf16.mxu0 %v1918_v1 }
  0xe4   :  { %v442_v8 = vadd.f32 %v410_v7, %v246_v41  ;;  %v368_v7 = vpop.permute.xlu0 %367 }
  0xe5   :  { %v332_v10 = vpop.permute.xlu1 %331 }
  0xe6   :  { %v411_v12 = vmul.f32 %v2147_v50, %v332_v10  ;;  %v481_v13 = vadd.f32 %v2161_v58, %v442_v8 }
  0xe8   :  { %v443_v14 = vadd.f32 %v411_v12, %v247_v9  ;;  %v513_v19 = vmax.f32 %v481_v13, 0.0  ;;  %v255_v12 = vmul.f32 %v2150_v51, %v194_v4 }
  0xea   :  { %v482_v17 = vadd.f32 %v2161_v58, %v443_v14  ;;  %v164_v18 = vpop.permute.xlu1 %163  ;;  %v199_v14 = vpop.permute.xlu0 %198 }
  0xeb   :  { %v249_v23 = vmul.f32 %v2150_v51, %v164_v18  ;;  %v256_v18 = vmul.f32 %v2150_v51, %v199_v14  ;;  %v1908_v14 = vld [vmem:[%s2647_s5 + $0x38] sm:$0xff]  }
  0xec   :  { %v514_v20 = vmax.f32 %v482_v17, 0.0  ;;  %v420_v17 = vmul.f32 %v2147_v50, %v368_v7  ;;  %v1906_v7 = vld [vmem:[%s2647_s5 + $0x30] sm:$0xff]  }
  0xee   :  { %v537_v0 = vpack.c.bf16 %v514_v20, %v513_v19 }
  0xef   :  { %v340_v22 = vpop.permute.xlu1 %339 }
  0xf0   :  { %v413_v24 = vmul.f32 %v2147_v50, %v340_v22  ;;  %754 = vmatmul.mubr.bf16.gmra.mrb[32].mxu0 %v537_v0  ;;  %v452_v22 = vadd.f32 %v420_v17, %v256_v18 }
  0xf1   :  { %763 = vmatprep.mubr.bf16.mxu0 %v1918_v1 }
  0xf2   :  { %v445_v26 = vadd.f32 %v413_v24, %v249_v23  ;;  %v1894_v23 = vld [vmem:[%s2647_s5] sm:$0xff]  }
  0xf4   :  { %v484_v28 = vadd.f32 %v2161_v58, %v445_v26  ;;  %v169_v30 = vpop.permute.xlu1 %168 }
  0xf5   :  { %v250_v35 = vmul.f32 %v2150_v51, %v169_v30  ;;  %v1896_v30 = vld [vmem:[%s2647_s5 + $0x8] sm:$0xff]  }
  0xf6   :  { %v516_v31 = vmax.f32 %v484_v28, 0.0  ;;  %v491_v28 = vadd.f32 %v2161_v58, %v452_v22 }
  0xf8   :  { %v538_v32 = vpack.c.bf16 %v516_v31, %v515_v29  ;;  %v523_v34 = vmax.f32 %v491_v28, 0.0 }
  0xf9   :  { %v344_v33 = vpop.permute.xlu1 %343 }
  0xfa   :  { %v414_v36 = vmul.f32 %v2147_v50, %v344_v33  ;;  %764 = vmatmul.mubr.bf16.gmra.mrb[36].mxu0 %v538_v32  ;;  %v1897_v32 = vld [vmem:[%s2647_s5 + $0x50] sm:$0xff]   ;;  %v214_v33 = vpop.permute.xlu0 %213 }
  0xfb   :  { %773 = vmatprep.mubr.bf16.mxu0 %v1918_v1  ;;  %v259_v55 = vmul.f32 %v2150_v51, %v214_v33 }
  0xfc   :  { %v446_v37 = vadd.f32 %v414_v36, %v250_v35 }
  0xfd   :  { %v348_v39 = vpop.permute.xlu1 %347 }
  0xfe   :  { %v415_v42 = vmul.f32 %v2147_v50, %v348_v39  ;;  %v485_v43 = vadd.f32 %v2161_v58, %v446_v37  ;;  %v1898_v37 = vld [vmem:[%s2647_s5 + $0x10] sm:$0xff]   ;;  %v1899_v39 = vld [vmem:[%s2647_s5 + $0x58] sm:$0xff]  }
 0x100   :  { %v447_v45 = vadd.f32 %v415_v42, %v251_v38  ;;  %v517_v53 = vmax.f32 %v485_v43, 0.0  ;;  %v219_v42 = vpop.permute.xlu0 %218 }
 0x102   :  { %v486_v49 = vadd.f32 %v2161_v58, %v447_v45  ;;  %v184_v52 = vpop.permute.xlu1 %183 }
 0x103   :  { %v253_v59 = vmul.f32 %v2150_v51, %v184_v52 }
 0x104   :  { %v518_v54 = vmax.f32 %v486_v49, 0.0  ;;  %v1901_v49 = vld [vmem:[%s2647_s5 + $0x60] sm:$0xff]  }
 0x106   :  { %v539_v56 = vpack.c.bf16 %v518_v54, %v517_v53  ;;  %v1902_v54 = vld [vmem:[%s2647_s5 + $0x20] sm:$0xff]  }
 0x107   :  { %v356_v57 = vpop.permute.xlu1 %355 }
 0x108   :  { %v417_v61 = vmul.f32 %v2147_v50, %v356_v57  ;;  %774 = vmatmul.mubr.bf16.gmra.mrb[40].mxu0 %v539_v56  ;;  %v1903_v57 = vld [vmem:[%s2647_s5 + $0x68] sm:$0xff]  }
 0x109   :  { %783 = vmatprep.mubr.bf16.mxu0 %v1918_v1 }
 0x10a   :  { %v449_v62 = vadd.f32 %v417_v61, %v253_v59  ;;  %v384_v59 = vpop.permute.xlu0 %383 }
 0x10c   :  { %v488_v2 = vadd.f32 %v2161_v58, %v449_v62  ;;  %v189_v3 = vpop.permute.xlu1 %188  ;;  %v1904_v62 = vld [vmem:[%s2647_s5 + $0x28] sm:$0xff]  }
 0x10d   :  { %v254_v8 = vmul.f32 %v2150_v51, %v189_v3 }
 0x10e   :  { %v520_v5 = vmax.f32 %v488_v2, 0.0  ;;  %v424_v2 = vmul.f32 %v2147_v50, %v384_v59 }
 0x110   :  { %v540_v6 = vpack.c.bf16 %v520_v5, %v519_v63  ;;  %v260_v63 = vmul.f32 %v2150_v51, %v219_v42  ;;  %v1905_v5 = vld [vmem:[%s2647_s5 + $0x70] sm:$0xff]  }
 0x111   :  { %v360_v41 = vpop.permute.xlu1 %359 }
 0x112   :  { %v418_v9 = vmul.f32 %v2147_v50, %v360_v41  ;;  %784 = vmatmul.mubr.bf16.gmra.mrb[44].mxu0 %v540_v6 }
 0x114   :  { %v450_v10 = vadd.f32 %v418_v9, %v254_v8  ;;  %v456_v8 = vadd.f32 %v424_v2, %v260_v63 }
 0x115   :  { %v364_v11 = vpop.permute.xlu1 %363 }
 0x116   :  { %v419_v13 = vmul.f32 %v2147_v50, %v364_v11  ;;  %v489_v15 = vadd.f32 %v2161_v58, %v450_v10  ;;  %v1907_v10 = vld [vmem:[%s2647_s5 + $0x78] sm:$0xff]  }
 0x118   :  { %v451_v16 = vadd.f32 %v419_v13, %v255_v12  ;;  %v521_v21 = vmax.f32 %v489_v15, 0.0  ;;  %v495_v15 = vadd.f32 %v2161_v58, %v456_v8 }
 0x11a   :  { %v490_v19 = vadd.f32 %v2161_v58, %v451_v16  ;;  %v204_v20 = vpop.permute.xlu1 %203  ;;  %v527_v18 = vmax.f32 %v495_v15, 0.0 }
 0x11b   :  { %v257_v27 = vmul.f32 %v2150_v51, %v204_v20 }
 0x11c   :  { %v522_v0 = vmax.f32 %v490_v19, 0.0 }
 0x11e   :  { %v541_v24 = vpack.c.bf16 %v522_v0, %v521_v21  ;;  %v1599_v0 = vld.sshfl [vmem:[%s2648_s4] sm:$0x11 pattern:$0x75316420] }
 0x11f   :  { %v372_v26 = vpop.permute.xlu1 %371 }
 0x120   :  { %v421_v29 = vmul.f32 %v2147_v50, %v372_v26  ;;  %794 = vmatmul.mubr.bf16.vlgmr.msra.gmra.mrb[0].mxu1 %v541_v24 }
 0x121   :  { %803 = vmatprep.mubr.bf16.mxu1 %v1918_v1  ;;  %1626 = vmatpush3.bf16.msra.mxu1 %v1894_v23  ;;  %v875_v23 = vcombine.high %v1599_v0, %v1599_v0 }
 0x122   :  { %v453_v31 = vadd.f32 %v421_v29, %v257_v27  ;;  %1627 = vmatprep.subr.bf16.mxu1 %v1895_v25 }
 0x124   :  { %v492_v35 = vadd.f32 %v2161_v58, %v453_v31  ;;  %v209_v36 = vpop.permute.xlu1 %208 }
 0x125   :  { %1628 = vmatpush3.bf16.msra.mxu1 %v1896_v30  ;;  %v258_v45 = vmul.f32 %v2150_v51, %v209_v36 }
 0x126   :  { %v524_v38 = vmax.f32 %v492_v35, 0.0  ;;  %1629 = vmatprep.subr.bf16.mxu1 %v1897_v32 }
 0x128   :  { %v542_v40 = vpack.c.bf16 %v524_v38, %v523_v34 }
 0x129   :  { %v376_v43 = vpop.permute.xlu1 %375  ;;  %1630 = vmatpush3.bf16.msra.mxu1 %v1898_v37 }
 0x12a   :  { %v422_v47 = vmul.f32 %v2147_v50, %v376_v43  ;;  %804 = vmatmul.mubr.bf16.gmra.mrb[4].mxu1 %v542_v40  ;;  %1631 = vmatprep.subr.bf16.mxu1 %v1899_v39 }
 0x12b   :  { %813 = vmatprep.mubr.bf16.mxu1 %v1918_v1 }
 0x12c   :  { %v454_v52 = vadd.f32 %v422_v47, %v258_v45 }
 0x12d   :  { %v380_v53 = vpop.permute.xlu1 %379  ;;  %1632 = vmatpush3.bf16.msra.mxu1 %v1900_v44 }
 0x12e   :  { %v423_v56 = vmul.f32 %v2147_v50, %v380_v53  ;;  %1633 = vmatprep.subr.bf16.mxu1 %v1901_v49  ;;  %v493_v60 = vadd.f32 %v2161_v58, %v454_v52 }
 0x130   :  { %v455_v61 = vadd.f32 %v423_v56, %v259_v55  ;;  %v525_v6 = vmax.f32 %v493_v60, 0.0 }
 0x131   :  { %1634 = vmatpush3.bf16.msra.mxu1 %v1902_v54 }
 0x132   :  { %v494_v3 = vadd.f32 %v2161_v58, %v455_v61  ;;  %v224_v4 = vpop.permute.xlu1 %223  ;;  %1635 = vmatprep.subr.bf16.mxu1 %v1903_v57 }
 0x133   :  { %v261_v12 = vmul.f32 %v2150_v51, %v224_v4 }
 0x134   :  { %v526_v41 = vmax.f32 %v494_v3, 0.0 }
 0x135   :  { %1636 = vmatpush3.bf16.msra.mxu1 %v1904_v62 }
 0x136   :  { %v543_v9 = vpack.c.bf16 %v526_v41, %v525_v6  ;;  %1637 = vmatprep.subr.bf16.mxu1 %v1905_v5 }
 0x137   :  { %v388_v11 = vpop.permute.xlu1 %387 }
 0x138   :  { %v425_v13 = vmul.f32 %v2147_v50, %v388_v11  ;;  %814 = vmatmul.mubr.bf16.gmra.mrb[8].mxu1 %v543_v9  ;;  %v1919_v50 = vmov 1966171168  }
 0x139   :  { %823 = vmatprep.mubr.bf16.mxu1 %v1918_v1  ;;  %1638 = vmatpush3.bf16.msra.mxu1 %v1906_v7  ;;  %v877_v20 = vunpack.c.l.s4 %v1919_v50 }
 0x13a   :  { %v457_v16 = vadd.f32 %v425_v13, %v261_v12  ;;  %1639 = vmatprep.subr.bf16.mxu1 %v1907_v10 }
 0x13b   :  { %v878_v21 = vunpack.c.0.s8 %v877_v20 }
 0x13c   :  { %v496_v17 = vadd.f32 %v2161_v58, %v457_v16 }
 0x13d   :  { %1640 = vmatpush3.bf16.msra.mxu1 %v1908_v14  ;;  %v881_v22 = vsub.s32 %v878_v21, %v2137_v46 }
 0x13e   :  { %v528_v19 = vmax.f32 %v496_v17, 0.0 }
 0x13f   :  { %v882_v24 = vrot.slane %v1599_v0, %v881_v22  ;;  %v889_v25 = vrot.slane %v875_v23, %v881_v22 }
 0x140   :  { %v544_v51 = vpack.c.bf16 %v528_v19, %v527_v18 }
 0x141   :  { %v891_v26 = vpack.i.b16 %v882_v24, %v882_v24  ;;  %v898_v27 = vpack.i.b16 %v889_v25, %v889_v25  ;;  %v1909_v24 = vld [vmem:[%s2649_s7] sm:$0xff]  }
 0x142   :  { %824 = vmatmul.mubr.bf16.gmra.mrb[12].mxu1 %v544_v51  ;;  %1761 = vmatprep.subr.bf16.mxu0 %v1909_v24 }
 0x143   :  { %v2347_v29 = vrot.slane %v891_v26, %v2142_v48  ;;  %v2350_v31 = vrot.slane %v898_v27, %v2142_v48  ;;  %v1910_v26 = vld [vmem:[%s2649_s7 + $0x8] sm:$0xff]   ;;  %1762 = vmatpush3.bf16.msra.mxu0 %v1909_v24 }
 0x144   :  { %1763 = vmatprep.subr.bf16.mxu0 %v1910_v26 }
 0x147   :  { %1764 = vmatpush3.bf16.msra.mxu0 %v1910_v26 }
 0x163   :  { %v675_v58 = vpop.f32.mrb[0].mxu0 }
 0x164   :  { %v677_v28 = vpop.f32.mrb[1].mxu0 }
 0x165   :  { %v679_v30 = vpop.f32.mrb[2].mxu0 }
 0x166   :  { %v834_v32 = vpack.c.bf16 %v679_v30, %v675_v58  ;;  %v681_v33 = vpop.f32.mrb[3].mxu0  ;;  %v1911_v58 = vld [vmem:[%s2649_s7 + $0x10] sm:$0xff]  }
 0x167   :  { %v835_v34 = vpack.c.bf16 %v681_v33, %v677_v28  ;;  %1765 = vmatprep.subr.bf16.mxu0 %v1911_v58 }
 0x168   :  { %v904_v35 = vadd.bf16 %v2347_v29, %v834_v32  ;;  %1766 = vmatpush3.bf16.msra.mxu0 %v1911_v58 }
 0x169   :  { %v905_v46 = vadd.bf16 %v2350_v31, %v835_v34 }
 0x16a   :  { %v936_v37 = vmax.bf16 %v1918_v1, %v904_v35 }
 0x16b   :  { %v937_v36 = vmax.bf16 %v1918_v1, %v905_v46 }
 0x16d   :  { %v685_v38 = vpop.f32.mrb[4].mxu0  ;;  %1128 = vmatprep.mubr.bf16.mxu1 %v937_v36 }
 0x16e   :  { %v687_v39 = vpop.f32.mrb[5].mxu0  ;;  %1129 = vmatmul.mubr.bf16.vlgmr.msra.gmra.mrb[16].mxu1 %v936_v37 }
 0x16f   :  { %v689_v40 = vpop.f32.mrb[6].mxu0 }
 0x170   :  { %v836_v42 = vpack.c.bf16 %v689_v40, %v685_v38  ;;  %v691_v43 = vpop.f32.mrb[7].mxu0 }
 0x171   :  { %v837_v44 = vpack.c.bf16 %v691_v43, %v687_v39 }
 0x172   :  { %v906_v45 = vadd.bf16 %v2347_v29, %v836_v42 }
 0x173   :  { %v907_v47 = vadd.bf16 %v2350_v31, %v837_v44 }
 0x174   :  { %v938_v52 = vmax.bf16 %v1918_v1, %v906_v45 }
 0x175   :  { %v939_v49 = vmax.bf16 %v1918_v1, %v907_v47 }
 0x177   :  { %1136 = vmatprep.mubr.bf16.mxu1 %v939_v49 }
 0x178   :  { %1137 = vmatmul.mubr.bf16.gmra.mrb[20].mxu1 %v938_v52 }
 0x17b   :  { %v695_v53 = vpop.f32.mrb[8].mxu0 }
 0x17c   :  { %v697_v54 = vpop.f32.mrb[9].mxu0 }
 0x17d   :  { %v699_v55 = vpop.f32.mrb[10].mxu0 }
 0x17e   :  { %v838_v56 = vpack.c.bf16 %v699_v55, %v695_v53  ;;  %v701_v57 = vpop.f32.mrb[11].mxu0 }
 0x17f   :  { %v839_v59 = vpack.c.bf16 %v701_v57, %v697_v54 }
 0x180   :  { %v908_v60 = vadd.bf16 %v2347_v29, %v838_v56  ;;  %v1912_v56 = vld [vmem:[%s2649_s7 + $0x18] sm:$0xff]  }
 0x181   :  { %v909_v61 = vadd.bf16 %v2350_v31, %v839_v59  ;;  %1767 = vmatprep.subr.bf16.mxu0 %v1912_v56 }
 0x182   :  { %v940_v63 = vmax.bf16 %v1918_v1, %v908_v60  ;;  %1768 = vmatpush3.bf16.msra.mxu0 %v1912_v56 }
 0x183   :  { %v941_v62 = vmax.bf16 %v1918_v1, %v909_v61  ;;  %v1913_v61 = vld [vmem:[%s2649_s7 + $0x20] sm:$0xff]  }
 0x184   :  { %1769 = vmatprep.subr.bf16.mxu0 %v1913_v61 }
 0x185   :  { %v705_v2 = vpop.f32.mrb[12].mxu0  ;;  %1144 = vmatprep.mubr.bf16.mxu1 %v941_v62 }
 0x186   :  { %v707_v3 = vpop.f32.mrb[13].mxu0  ;;  %1145 = vmatmul.mubr.bf16.gmra.mrb[24].mxu1 %v940_v63  ;;  %1770 = vmatpush3.bf16.msra.mxu0 %v1913_v61 }
 0x187   :  { %v709_v4 = vpop.f32.mrb[14].mxu0 }
 0x188   :  { %v840_v5 = vpack.c.bf16 %v709_v4, %v705_v2  ;;  %v711_v6 = vpop.f32.mrb[15].mxu0 }
 0x189   :  { %v841_v41 = vpack.c.bf16 %v711_v6, %v707_v3 }
 0x18a   :  { %v910_v7 = vadd.bf16 %v2347_v29, %v840_v5  ;;  %v1914_v5 = vld [vmem:[%s2649_s7 + $0x28] sm:$0xff]  }
 0x18b   :  { %v911_v8 = vadd.bf16 %v2350_v31, %v841_v41  ;;  %1771 = vmatprep.subr.bf16.mxu0 %v1914_v5 }
 0x18c   :  { %v942_v10 = vmax.bf16 %v1918_v1, %v910_v7  ;;  %1772 = vmatpush3.bf16.msra.mxu0 %v1914_v5 }
 0x18d   :  { %v943_v9 = vmax.bf16 %v1918_v1, %v911_v8  ;;  %v1915_v8 = vld [vmem:[%s2649_s7 + $0x30] sm:$0xff]  }
 0x18e   :  { %1773 = vmatprep.subr.bf16.mxu0 %v1915_v8 }
 0x18f   :  { %1152 = vmatprep.mubr.bf16.mxu1 %v943_v9 }
 0x190   :  { %1153 = vmatmul.mubr.bf16.gmra.mrb[28].mxu1 %v942_v10  ;;  %1774 = vmatpush3.bf16.msra.mxu0 %v1915_v8 }
 0x193   :  { %v715_v11 = vpop.f32.mrb[16].mxu0 }
 0x194   :  { %v717_v12 = vpop.f32.mrb[17].mxu0 }
 0x195   :  { %v719_v13 = vpop.f32.mrb[18].mxu0 }
 0x196   :  { %v842_v14 = vpack.c.bf16 %v719_v13, %v715_v11  ;;  %v721_v15 = vpop.f32.mrb[19].mxu0 }
 0x197   :  { %v843_v16 = vpack.c.bf16 %v721_v15, %v717_v12 }
 0x198   :  { %v912_v17 = vadd.bf16 %v2347_v29, %v842_v14  ;;  %v1916_v14 = vld [vmem:[%s2649_s7 + $0x38] sm:$0xff]  }
 0x199   :  { %v913_v18 = vadd.bf16 %v2350_v31, %v843_v16  ;;  %1775 = vmatprep.subr.bf16.mxu0 %v1916_v14 }
 0x19a   :  { %v944_v51 = vmax.bf16 %v1918_v1, %v912_v17  ;;  %1776 = vmatpush3.bf16.msra.mxu0 %v1916_v14 }
 0x19b   :  { %v945_v19 = vmax.bf16 %v1918_v1, %v913_v18 }
 0x19d   :  { %v725_v50 = vpop.f32.mrb[20].mxu0  ;;  %1160 = vmatprep.mubr.bf16.mxu1 %v945_v19 }
 0x19e   :  { %v727_v20 = vpop.f32.mrb[21].mxu0  ;;  %1161 = vmatmul.mubr.bf16.gmra.mrb[32].mxu1 %v944_v51 }
 0x19f   :  { %v729_v21 = vpop.f32.mrb[22].mxu0 }
 0x1a0   :  { %v844_v0 = vpack.c.bf16 %v729_v21, %v725_v50  ;;  %v731_v22 = vpop.f32.mrb[23].mxu0 }
 0x1a1   :  { %v845_v23 = vpack.c.bf16 %v731_v22, %v727_v20 }
 0x1a2   :  { %v914_v25 = vadd.bf16 %v2347_v29, %v844_v0 }
 0x1a3   :  { %v915_v27 = vadd.bf16 %v2350_v31, %v845_v23 }
 0x1a4   :  { %v946_v30 = vmax.bf16 %v1918_v1, %v914_v25 }
 0x1a5   :  { %v947_v28 = vmax.bf16 %v1918_v1, %v915_v27 }
 0x1a7   :  { %1168 = vmatprep.mubr.bf16.mxu1 %v947_v28 }
 0x1a8   :  { %1169 = vmatmul.mubr.bf16.gmra.mrb[36].mxu1 %v946_v30 }
 0x1ab   :  { %v735_v32 = vpop.f32.mrb[24].mxu0 }
 0x1ac   :  { %v737_v33 = vpop.f32.mrb[25].mxu0 }
 0x1ad   :  { %v739_v34 = vpop.f32.mrb[26].mxu0 }
 0x1ae   :  { %v846_v35 = vpack.c.bf16 %v739_v34, %v735_v32  ;;  %v741_v46 = vpop.f32.mrb[27].mxu0 }
 0x1af   :  { %v847_v36 = vpack.c.bf16 %v741_v46, %v737_v33 }
 0x1b0   :  { %v916_v37 = vadd.bf16 %v2347_v29, %v846_v35 }
 0x1b1   :  { %v917_v38 = vadd.bf16 %v2350_v31, %v847_v36 }
 0x1b2   :  { %v948_v40 = vmax.bf16 %v1918_v1, %v916_v37 }
 0x1b3   :  { %v949_v39 = vmax.bf16 %v1918_v1, %v917_v38 }
 0x1b5   :  { %v745_v42 = vpop.f32.mrb[28].mxu0  ;;  %1176 = vmatprep.mubr.bf16.mxu1 %v949_v39 }
 0x1b6   :  { %v747_v43 = vpop.f32.mrb[29].mxu0  ;;  %1177 = vmatmul.mubr.bf16.gmra.mrb[40].mxu1 %v948_v40 }
 0x1b7   :  { %v749_v44 = vpop.f32.mrb[30].mxu0 }
 0x1b8   :  { %v848_v45 = vpack.c.bf16 %v749_v44, %v745_v42  ;;  %v751_v47 = vpop.f32.mrb[31].mxu0 }
 0x1b9   :  { %v849_v49 = vpack.c.bf16 %v751_v47, %v747_v43 }
 0x1ba   :  { %v918_v52 = vadd.bf16 %v2347_v29, %v848_v45 }
 0x1bb   :  { %v919_v53 = vadd.bf16 %v2350_v31, %v849_v49 }
 0x1bc   :  { %v950_v55 = vmax.bf16 %v1918_v1, %v918_v52 }
 0x1bd   :  { %v951_v54 = vmax.bf16 %v1918_v1, %v919_v53 }
 0x1bf   :  { %1184 = vmatprep.mubr.bf16.mxu1 %v951_v54 }
 0x1c0   :  { %1185 = vmatmul.mubr.bf16.gmra.mrb[44].mxu1 %v950_v55 }
 0x1c3   :  { %v755_v57 = vpop.f32.mrb[32].mxu0 }
 0x1c4   :  { %v757_v59 = vpop.f32.mrb[33].mxu0 }
 0x1c5   :  { %v759_v60 = vpop.f32.mrb[34].mxu0 }
 0x1c6   :  { %v850_v62 = vpack.c.bf16 %v759_v60, %v755_v57  ;;  %v761_v63 = vpop.f32.mrb[35].mxu0 }
 0x1c7   :  { %v851_v2 = vpack.c.bf16 %v761_v63, %v757_v59 }
 0x1c8   :  { %v920_v3 = vadd.bf16 %v2347_v29, %v850_v62 }
 0x1c9   :  { %v921_v4 = vadd.bf16 %v2350_v31, %v851_v2 }
 0x1ca   :  { %v952_v41 = vmax.bf16 %v1918_v1, %v920_v3 }
 0x1cb   :  { %v953_v6 = vmax.bf16 %v1918_v1, %v921_v4 }
 0x1cd   :  { %v765_v7 = vpop.f32.mrb[36].mxu0  ;;  %1192 = vmatprep.mubr.bf16.mxu1 %v953_v6 }
 0x1ce   :  { %v767_v9 = vpop.f32.mrb[37].mxu0  ;;  %1193 = vmatmul.mubr.bf16.gmra.mrb[48].mxu1 %v952_v41 }
 0x1cf   :  { %v769_v10 = vpop.f32.mrb[38].mxu0 }
 0x1d0   :  { %v852_v11 = vpack.c.bf16 %v769_v10, %v765_v7  ;;  %v771_v12 = vpop.f32.mrb[39].mxu0 }
 0x1d1   :  { %v853_v13 = vpack.c.bf16 %v771_v12, %v767_v9 }
 0x1d2   :  { %v922_v15 = vadd.bf16 %v2347_v29, %v852_v11 }
 0x1d3   :  { %v923_v16 = vadd.bf16 %v2350_v31, %v853_v13 }
 0x1d4   :  { %v954_v18 = vmax.bf16 %v1918_v1, %v922_v15 }
 0x1d5   :  { %v955_v17 = vmax.bf16 %v1918_v1, %v923_v16 }
 0x1d7   :  { %1200 = vmatprep.mubr.bf16.mxu1 %v955_v17 }
 0x1d8   :  { %1201 = vmatmul.mubr.bf16.gmra.mrb[52].mxu1 %v954_v18 }
 0x1db   :  { %v775_v19 = vpop.f32.mrb[40].mxu0 }
 0x1dc   :  { %v777_v51 = vpop.f32.mrb[41].mxu0 }
 0x1dd   :  { %v779_v50 = vpop.f32.mrb[42].mxu0 }
 0x1de   :  { %v854_v20 = vpack.c.bf16 %v779_v50, %v775_v19  ;;  %v781_v21 = vpop.f32.mrb[43].mxu0  ;;  %v1273_v19 = vld [vmem:[%s2650_s6] sm:$0x1] }
 0x1df   :  { %v855_v0 = vpack.c.bf16 %v781_v21, %v777_v51  ;;  %v1275_v50 = vpack.i.b16 %v1273_v19, %v1273_v19 }
 0x1e0   :  { %v924_v22 = vadd.bf16 %v2347_v29, %v854_v20 }
 0x1e1   :  { %v925_v23 = vadd.bf16 %v2350_v31, %v855_v0 }
 0x1e2   :  { %v956_v25 = vmax.bf16 %v1918_v1, %v924_v22 }
 0x1e3   :  { %v957_v24 = vmax.bf16 %v1918_v1, %v925_v23 }
 0x1e5   :  { %v785_v26 = vpop.f32.mrb[44].mxu0  ;;  %1208 = vmatprep.mubr.bf16.mxu1 %v957_v24 }
 0x1e6   :  { %v787_v27 = vpop.f32.mrb[45].mxu0  ;;  %1209 = vmatmul.mubr.bf16.gmra.mrb[56].mxu1 %v956_v25 }
 0x1e7   :  { %v789_v58 = vpop.f32.mrb[46].mxu0 }
 0x1e8   :  { %v856_v28 = vpack.c.bf16 %v789_v58, %v785_v26  ;;  %v791_v30 = vpop.f32.mrb[47].mxu0 }
 0x1e9   :  { %v857_v32 = vpack.c.bf16 %v791_v30, %v787_v27 }
 0x1ea   :  { %v926_v33 = vadd.bf16 %v2347_v29, %v856_v28 }
 0x1eb   :  { %v927_v34 = vadd.bf16 %v2350_v31, %v857_v32 }
 0x1ec   :  { %v958_v46 = vmax.bf16 %v1918_v1, %v926_v33 }
 0x1ed   :  { %v959_v35 = vmax.bf16 %v1918_v1, %v927_v34 }
 0x1ef   :  { %1216 = vmatprep.mubr.bf16.mxu1 %v959_v35 }
 0x1f0   :  { %1217 = vmatmul.mubr.bf16.gmra.mrb[60].mxu1 %v958_v46 }
 0x1f3   :  { %v795_v36 = vpop.f32.mrb[0].mxu1 }
 0x1f4   :  { %v797_v37 = vpop.f32.mrb[1].mxu1 }
 0x1f5   :  { %v799_v38 = vpop.f32.mrb[2].mxu1 }
 0x1f6   :  { %v858_v39 = vpack.c.bf16 %v799_v38, %v795_v36  ;;  %v801_v40 = vpop.f32.mrb[3].mxu1 }
 0x1f7   :  { %v859_v42 = vpack.c.bf16 %v801_v40, %v797_v37 }
 0x1f8   :  { %v928_v43 = vadd.bf16 %v2347_v29, %v858_v39 }
 0x1f9   :  { %v929_v44 = vadd.bf16 %v2350_v31, %v859_v42 }
 0x1fa   :  { %v960_v47 = vmax.bf16 %v1918_v1, %v928_v43 }
 0x1fb   :  { %v961_v45 = vmax.bf16 %v1918_v1, %v929_v44 }
 0x1fd   :  { %v805_v49 = vpop.f32.mrb[4].mxu1  ;;  %1224 = vmatprep.mubr.bf16.mxu1 %v961_v45 }
 0x1fe   :  { %v807_v52 = vpop.f32.mrb[5].mxu1  ;;  %1225 = vmatmul.mubr.bf16.gmra.mrb[64].mxu1 %v960_v47 }
 0x1ff   :  { %v809_v53 = vpop.f32.mrb[6].mxu1 }
 0x200   :  { %v860_v54 = vpack.c.bf16 %v809_v53, %v805_v49  ;;  %v811_v55 = vpop.f32.mrb[7].mxu1 }
 0x201   :  { %v861_v56 = vpack.c.bf16 %v811_v55, %v807_v52 }
 0x202   :  { %v930_v57 = vadd.bf16 %v2347_v29, %v860_v54 }
 0x203   :  { %v931_v59 = vadd.bf16 %v2350_v31, %v861_v56 }
 0x204   :  { %v962_v61 = vmax.bf16 %v1918_v1, %v930_v57 }
 0x205   :  { %v963_v60 = vmax.bf16 %v1918_v1, %v931_v59 }
 0x207   :  { %1232 = vmatprep.mubr.bf16.mxu1 %v963_v60 }
 0x208   :  { %1233 = vmatmul.mubr.bf16.gmra.mrb[68].mxu1 %v962_v61 }
 0x20b   :  { %v815_v62 = vpop.f32.mrb[8].mxu1 }
 0x20c   :  { %v817_v63 = vpop.f32.mrb[9].mxu1 }
 0x20d   :  { %v819_v2 = vpop.f32.mrb[10].mxu1 }
 0x20e   :  { %v862_v3 = vpack.c.bf16 %v819_v2, %v815_v62  ;;  %v821_v4 = vpop.f32.mrb[11].mxu1 }
 0x20f   :  { %v863_v5 = vpack.c.bf16 %v821_v4, %v817_v63 }
 0x210   :  { %v932_v6 = vadd.bf16 %v2347_v29, %v862_v3 }
 0x211   :  { %v933_v41 = vadd.bf16 %v2350_v31, %v863_v5 }
 0x212   :  { %v964_v8 = vmax.bf16 %v1918_v1, %v932_v6 }
 0x213   :  { %v965_v7 = vmax.bf16 %v1918_v1, %v933_v41 }
 0x215   :  { %v825_v9 = vpop.f32.mrb[12].mxu1  ;;  %1240 = vmatprep.mubr.bf16.mxu1 %v965_v7 }
 0x216   :  { %v827_v10 = vpop.f32.mrb[13].mxu1  ;;  %1241 = vmatmul.mubr.bf16.gmra.mrb[72].mxu1 %v964_v8 }
 0x217   :  { %v829_v11 = vpop.f32.mrb[14].mxu1 }
 0x218   :  { %v864_v12 = vpack.c.bf16 %v829_v11, %v825_v9  ;;  %v831_v13 = vpop.f32.mrb[15].mxu1 }
 0x219   :  { %v865_v14 = vpack.c.bf16 %v831_v13, %v827_v10 }
 0x21a   :  { %v934_v15 = vadd.bf16 %v2347_v29, %v864_v12  ;;  %v2444_v29 = vrot.slane %v1275_v50, %v2142_v48 }
 0x21b   :  { %v935_v16 = vadd.bf16 %v2350_v31, %v865_v14 }
 0x21c   :  { %v966_v18 = vmax.bf16 %v1918_v1, %v934_v15 }
 0x21d   :  { %v967_v17 = vmax.bf16 %v1918_v1, %v935_v16 }
 0x21f   :  { %1248 = vmatprep.mubr.bf16.mxu1 %v967_v17 }
 0x220   :  { %1249 = vmatmul.mubr.bf16.gmra.mrb[76].mxu1 %v966_v18 }
 0x241   :  { %v1641_v51 = vpop.f32.mrb[16].mxu1 }
 0x242   :  { %v1642_v20 = vpop.f32.mrb[17].mxu1 }
 0x243   :  { %v1643_v21 = vadd.f32 %v1642_v20, %v1641_v51  ;;  %v1644_v0 = vpop.f32.mrb[18].mxu1 }
 0x244   :  { %v1645_v22 = vpop.f32.mrb[19].mxu1 }
 0x245   :  { %v1646_v23 = vadd.f32 %v1645_v22, %v1644_v0 }
 0x247   :  { %v1257_v31 = vpack.c.bf16 %v1646_v23, %v1643_v21 }
 0x249   :  { %v1281_v24 = vadd.bf16 %v2444_v29, %v1257_v31 }
 0x24b   :  { %v1647_v25 = vpop.f32.mrb[20].mxu1  ;;  %v1297_v26 = vmax.bf16 %v1918_v1, %v1281_v24 }
 0x24c   :  { %v1648_v27 = vpop.f32.mrb[21].mxu1 }
 0x24d   :  { %v1649_v58 = vadd.f32 %v1648_v27, %v1647_v25  ;;  %v1650_v28 = vpop.f32.mrb[22].mxu1  ;;  %1777 = vmatprep.mubr.bf16.mxu0 %v1297_v26 }
 0x24e   :  { %v1651_v30 = vpop.f32.mrb[23].mxu1 }
 0x24f   :  { %v1652_v32 = vadd.f32 %v1651_v30, %v1650_v28 }
 0x251   :  { %v1258_v33 = vpack.c.bf16 %v1652_v32, %v1649_v58 }
 0x253   :  { %v1282_v34 = vadd.bf16 %v2444_v29, %v1258_v33 }
 0x255   :  { %v1298_v35 = vmax.bf16 %v1918_v1, %v1282_v34 }
 0x257   :  { %1778 = vmatmul.mubr.bf16.vlgmr.msra.gmra.mrb[48].mxu0 %v1298_v35 }
 0x259   :  { %v1653_v48 = vpop.f32.mrb[24].mxu1 }
 0x25a   :  { %v1654_v46 = vpop.f32.mrb[25].mxu1 }
 0x25b   :  { %v1655_v36 = vadd.f32 %v1654_v46, %v1653_v48  ;;  %v1656_v37 = vpop.f32.mrb[26].mxu1 }
 0x25c   :  { %v1657_v38 = vpop.f32.mrb[27].mxu1 }
 0x25d   :  { %v1658_v39 = vadd.f32 %v1657_v38, %v1656_v37 }
 0x25f   :  { %v1259_v40 = vpack.c.bf16 %v1658_v39, %v1655_v36 }
 0x261   :  { %v1283_v42 = vadd.bf16 %v2444_v29, %v1259_v40 }
 0x263   :  { %v1659_v43 = vpop.f32.mrb[28].mxu1  ;;  %v1299_v44 = vmax.bf16 %v1918_v1, %v1283_v42 }
 0x264   :  { %v1660_v45 = vpop.f32.mrb[29].mxu1 }
 0x265   :  { %v1661_v47 = vadd.f32 %v1660_v45, %v1659_v43  ;;  %v1662_v49 = vpop.f32.mrb[30].mxu1  ;;  %1781 = vmatprep.mubr.bf16.mxu0 %v1299_v44 }
 0x266   :  { %v1663_v52 = vpop.f32.mrb[31].mxu1 }
 0x267   :  { %v1664_v53 = vadd.f32 %v1663_v52, %v1662_v49 }
 0x269   :  { %v1260_v54 = vpack.c.bf16 %v1664_v53, %v1661_v47 }
 0x26b   :  { %v1284_v55 = vadd.bf16 %v2444_v29, %v1260_v54 }
 0x26d   :  { %v1300_v56 = vmax.bf16 %v1918_v1, %v1284_v55 }
 0x26f   :  { %1782 = vmatmul.mubr.bf16.gmra.mrb[52].mxu0 %v1300_v56 }
 0x271   :  { %v1665_v57 = vpop.f32.mrb[32].mxu1 }
 0x272   :  { %v1666_v59 = vpop.f32.mrb[33].mxu1 }
 0x273   :  { %v1667_v60 = vadd.f32 %v1666_v59, %v1665_v57  ;;  %v1668_v61 = vpop.f32.mrb[34].mxu1 }
 0x274   :  { %v1669_v62 = vpop.f32.mrb[35].mxu1 }
 0x275   :  { %v1670_v63 = vadd.f32 %v1669_v62, %v1668_v61 }
 0x277   :  { %v1261_v2 = vpack.c.bf16 %v1670_v63, %v1667_v60 }
 0x279   :  { %v1285_v3 = vadd.bf16 %v2444_v29, %v1261_v2 }
 0x27b   :  { %v1671_v4 = vpop.f32.mrb[36].mxu1  ;;  %v1301_v5 = vmax.bf16 %v1918_v1, %v1285_v3 }
 0x27c   :  { %v1672_v6 = vpop.f32.mrb[37].mxu1 }
 0x27d   :  { %v1673_v41 = vadd.f32 %v1672_v6, %v1671_v4  ;;  %v1674_v7 = vpop.f32.mrb[38].mxu1  ;;  %1785 = vmatprep.mubr.bf16.mxu0 %v1301_v5 }
 0x27e   :  { %v1675_v8 = vpop.f32.mrb[39].mxu1 }
 0x27f   :  { %v1676_v9 = vadd.f32 %v1675_v8, %v1674_v7 }
 0x281   :  { %v1262_v10 = vpack.c.bf16 %v1676_v9, %v1673_v41 }
 0x283   :  { %v1286_v11 = vadd.bf16 %v2444_v29, %v1262_v10 }
 0x285   :  { %v1302_v12 = vmax.bf16 %v1918_v1, %v1286_v11 }
 0x287   :  { %1786 = vmatmul.mubr.bf16.gmra.mrb[56].mxu0 %v1302_v12 }
 0x289   :  { %v1677_v13 = vpop.f32.mrb[40].mxu1 }
 0x28a   :  { %v1678_v14 = vpop.f32.mrb[41].mxu1 }
 0x28b   :  { %v1679_v15 = vadd.f32 %v1678_v14, %v1677_v13  ;;  %v1680_v16 = vpop.f32.mrb[42].mxu1 }
 0x28c   :  { %v1681_v17 = vpop.f32.mrb[43].mxu1 }
 0x28d   :  { %v1682_v18 = vadd.f32 %v1681_v17, %v1680_v16 }
 0x28f   :  { %v1263_v19 = vpack.c.bf16 %v1682_v18, %v1679_v15 }
 0x291   :  { %v1287_v51 = vadd.bf16 %v2444_v29, %v1263_v19 }
 0x293   :  { %v1683_v50 = vpop.f32.mrb[44].mxu1  ;;  %v1303_v20 = vmax.bf16 %v1918_v1, %v1287_v51 }
 0x294   :  { %v1684_v21 = vpop.f32.mrb[45].mxu1 }
 0x295   :  { %v1685_v0 = vadd.f32 %v1684_v21, %v1683_v50  ;;  %v1686_v22 = vpop.f32.mrb[46].mxu1  ;;  %1789 = vmatprep.mubr.bf16.mxu0 %v1303_v20 }
 0x296   :  { %v1687_v23 = vpop.f32.mrb[47].mxu1 }
 0x297   :  { %v1688_v31 = vadd.f32 %v1687_v23, %v1686_v22 }
 0x299   :  { %v1264_v24 = vpack.c.bf16 %v1688_v31, %v1685_v0 }
 0x29b   :  { %v1288_v25 = vadd.bf16 %v2444_v29, %v1264_v24 }
 0x29d   :  { %v1304_v26 = vmax.bf16 %v1918_v1, %v1288_v25 }
 0x29f   :  { %1790 = vmatmul.mubr.bf16.gmra.mrb[60].mxu0 %v1304_v26 }
 0x2a1   :  { %v1689_v27 = vpop.f32.mrb[48].mxu1 }
 0x2a2   :  { %v1690_v58 = vpop.f32.mrb[49].mxu1 }
 0x2a3   :  { %v1691_v28 = vadd.f32 %v1690_v58, %v1689_v27  ;;  %v1692_v30 = vpop.f32.mrb[50].mxu1 }
 0x2a4   :  { %v1693_v32 = vpop.f32.mrb[51].mxu1 }
 0x2a5   :  { %v1694_v33 = vadd.f32 %v1693_v32, %v1692_v30 }
 0x2a7   :  { %v1265_v34 = vpack.c.bf16 %v1694_v33, %v1691_v28 }
 0x2a9   :  { %v1289_v35 = vadd.bf16 %v2444_v29, %v1265_v34 }
 0x2ab   :  { %v1695_v48 = vpop.f32.mrb[52].mxu1  ;;  %v1305_v46 = vmax.bf16 %v1918_v1, %v1289_v35 }
 0x2ac   :  { %v1696_v36 = vpop.f32.mrb[53].mxu1 }
 0x2ad   :  { %v1697_v37 = vadd.f32 %v1696_v36, %v1695_v48  ;;  %v1698_v38 = vpop.f32.mrb[54].mxu1  ;;  %1793 = vmatprep.mubr.bf16.mxu0 %v1305_v46  ;;  %v2481_v36 = vld [vmem:[%s2651_s8] ss:$0 sm:$0xff] }
 0x2ae   :  { %v1699_v39 = vpop.f32.mrb[55].mxu1 }
 0x2af   :  { %v1700_v40 = vadd.f32 %v1699_v39, %v1698_v38 }
 0x2b1   :  { %v1266_v42 = vpack.c.bf16 %v1700_v40, %v1697_v37 }
 0x2b3   :  { %v1290_v43 = vadd.bf16 %v2444_v29, %v1266_v42 }
 0x2b5   :  { %v1306_v44 = vmax.bf16 %v1918_v1, %v1290_v43 }
 0x2b7   :  { %1794 = vmatmul.mubr.bf16.gmra.mrb[64].mxu0 %v1306_v44 }
 0x2b9   :  { %v1701_v45 = vpop.f32.mrb[56].mxu1 }
 0x2ba   :  { %v1702_v47 = vpop.f32.mrb[57].mxu1 }
 0x2bb   :  { %v1703_v49 = vadd.f32 %v1702_v47, %v1701_v45  ;;  %v1704_v52 = vpop.f32.mrb[58].mxu1 }
 0x2bc   :  { %v1705_v53 = vpop.f32.mrb[59].mxu1 }
 0x2bd   :  { %v1706_v54 = vadd.f32 %v1705_v53, %v1704_v52 }
 0x2bf   :  { %v1267_v55 = vpack.c.bf16 %v1706_v54, %v1703_v49 }
 0x2c1   :  { %v1291_v56 = vadd.bf16 %v2444_v29, %v1267_v55 }
 0x2c3   :  { %v1707_v57 = vpop.f32.mrb[60].mxu1  ;;  %v1307_v59 = vmax.bf16 %v1918_v1, %v1291_v56 }
 0x2c4   :  { %v1708_v60 = vpop.f32.mrb[61].mxu1 }
 0x2c5   :  { %v1709_v61 = vadd.f32 %v1708_v60, %v1707_v57  ;;  %v1710_v62 = vpop.f32.mrb[62].mxu1  ;;  %1797 = vmatprep.mubr.bf16.mxu0 %v1307_v59 }
 0x2c6   :  { %v1711_v63 = vpop.f32.mrb[63].mxu1 }
 0x2c7   :  { %v1712_v2 = vadd.f32 %v1711_v63, %v1710_v62 }
 0x2c9   :  { %v1268_v3 = vpack.c.bf16 %v1712_v2, %v1709_v61 }
 0x2cb   :  { %v1292_v4 = vadd.bf16 %v2444_v29, %v1268_v3 }
 0x2cd   :  { %v1308_v5 = vmax.bf16 %v1918_v1, %v1292_v4 }
 0x2cf   :  { %1798 = vmatmul.mubr.bf16.gmra.mrb[68].mxu0 %v1308_v5 }
 0x2d1   :  { %v1713_v6 = vpop.f32.mrb[64].mxu1 }
 0x2d2   :  { %v1714_v41 = vpop.f32.mrb[65].mxu1 }
 0x2d3   :  { %v1715_v7 = vadd.f32 %v1714_v41, %v1713_v6  ;;  %v1716_v8 = vpop.f32.mrb[66].mxu1 }
 0x2d4   :  { %v1717_v9 = vpop.f32.mrb[67].mxu1 }
 0x2d5   :  { %v1718_v10 = vadd.f32 %v1717_v9, %v1716_v8 }
 0x2d7   :  { %v1269_v11 = vpack.c.bf16 %v1718_v10, %v1715_v7 }
 0x2d9   :  { %v1293_v12 = vadd.bf16 %v2444_v29, %v1269_v11 }
 0x2db   :  { %v1719_v13 = vpop.f32.mrb[68].mxu1  ;;  %v1309_v14 = vmax.bf16 %v1918_v1, %v1293_v12 }
 0x2dc   :  { %v1720_v15 = vpop.f32.mrb[69].mxu1 }
 0x2dd   :  { %v1721_v16 = vadd.f32 %v1720_v15, %v1719_v13  ;;  %v1722_v17 = vpop.f32.mrb[70].mxu1  ;;  %1801 = vmatprep.mubr.bf16.mxu0 %v1309_v14 }
 0x2de   :  { %v1723_v18 = vpop.f32.mrb[71].mxu1 }
 0x2df   :  { %v1724_v19 = vadd.f32 %v1723_v18, %v1722_v17 }
 0x2e1   :  { %v1270_v51 = vpack.c.bf16 %v1724_v19, %v1721_v16 }
 0x2e3   :  { %v1294_v50 = vadd.bf16 %v2444_v29, %v1270_v51 }
 0x2e5   :  { %v1310_v20 = vmax.bf16 %v1918_v1, %v1294_v50 }
 0x2e7   :  { %1802 = vmatmul.mubr.bf16.gmra.mrb[72].mxu0 %v1310_v20 }
 0x2e9   :  { %v1725_v21 = vpop.f32.mrb[72].mxu1 }
 0x2ea   :  { %v1726_v0 = vpop.f32.mrb[73].mxu1 }
 0x2eb   :  { %v1727_v22 = vadd.f32 %v1726_v0, %v1725_v21  ;;  %v1728_v23 = vpop.f32.mrb[74].mxu1 }
 0x2ec   :  { %v1729_v31 = vpop.f32.mrb[75].mxu1 }
 0x2ed   :  { %v1730_v24 = vadd.f32 %v1729_v31, %v1728_v23 }
 0x2ef   :  { %v1271_v25 = vpack.c.bf16 %v1730_v24, %v1727_v22 }
 0x2f1   :  { %v1295_v26 = vadd.bf16 %v2444_v29, %v1271_v25 }
 0x2f3   :  { %v1731_v27 = vpop.f32.mrb[76].mxu1  ;;  %v1311_v58 = vmax.bf16 %v1918_v1, %v1295_v26 }
 0x2f4   :  { %v1732_v28 = vpop.f32.mrb[77].mxu1 }
 0x2f5   :  { %v1733_v30 = vadd.f32 %v1732_v28, %v1731_v27  ;;  %v1734_v32 = vpop.f32.mrb[78].mxu1  ;;  %1805 = vmatprep.mubr.bf16.mxu0 %v1311_v58 }
 0x2f6   :  { %v1735_v33 = vpop.f32.mrb[79].mxu1 }
 0x2f7   :  { %v1736_v34 = vadd.f32 %v1735_v33, %v1734_v32 }
 0x2f9   :  { %v1272_v35 = vpack.c.bf16 %v1736_v34, %v1733_v30 }
 0x2fb   :  { %v1296_v48 = vadd.bf16 %v2444_v29, %v1272_v35 }
 0x2fd   :  { %v1312_v46 = vmax.bf16 %v1918_v1, %v1296_v48 }
 0x2ff   :  { %1806 = vmatmul.mubr.bf16.gmra.mrb[76].mxu0 %v1312_v46 }
 0x32a   :  { %v1779_v37 = vpop.f32.mrb[48].mxu0 }
 0x32b   :  { %v1427_v38 = vadd.f32 %v1779_v37, %v2481_v36  ;;  %v1418_v39 = vpop.f32.mrb[49].mxu0 }
 0x32c   :  { %v1419_v40 = vadd.f32 %v2481_v36, %v1418_v39  ;;  %v1780_v42 = vpop.f32.mrb[50].mxu0 }
 0x32d   :  { %1548 = vst.msk [vmem:[%s2652_s9 + $0x10] sm:$0xff] %vm1545_vm0, %v1427_v38  ;;  %v1430_v1 = vadd.f32 %v1780_v42, %v2481_v36  ;;  %v1421_v29 = vpop.f32.mrb[51].mxu0 }
 0x32e   :  { %1546 = vst.msk [vmem:[%s2652_s9] sm:$0xff] %vm1545_vm0, %v1419_v40  ;;  %v1422_v43 = vadd.f32 %v2481_v36, %v1421_v29 }
 0x32f   :  { %1549 = vst.msk [vmem:[%s2652_s9 + $0x18] sm:$0xff] %vm1545_vm0, %v1430_v1 }
 0x330   :  { %1547 = vst.msk [vmem:[%s2652_s9 + $0x8] sm:$0xff] %vm1545_vm0, %v1422_v43 }
 0x342   :  { %v1783_v44 = vpop.f32.mrb[52].mxu0 }
 0x343   :  { %v1443_v45 = vadd.f32 %v1783_v44, %v2481_v36  ;;  %v1434_v47 = vpop.f32.mrb[53].mxu0 }
 0x344   :  { %v1435_v49 = vadd.f32 %v2481_v36, %v1434_v47  ;;  %v1784_v52 = vpop.f32.mrb[54].mxu0 }
 0x345   :  { %1552 = vst.msk [vmem:[%s2652_s9 + $0x30] sm:$0xff] %vm1545_vm0, %v1443_v45  ;;  %v1446_v53 = vadd.f32 %v1784_v52, %v2481_v36  ;;  %v1437_v54 = vpop.f32.mrb[55].mxu0 }
 0x346   :  { %1550 = vst.msk [vmem:[%s2652_s9 + $0x20] sm:$0xff] %vm1545_vm0, %v1435_v49  ;;  %v1438_v55 = vadd.f32 %v2481_v36, %v1437_v54 }
 0x347   :  { %1553 = vst.msk [vmem:[%s2652_s9 + $0x38] sm:$0xff] %vm1545_vm0, %v1446_v53 }
 0x348   :  { %1551 = vst.msk [vmem:[%s2652_s9 + $0x28] sm:$0xff] %vm1545_vm0, %v1438_v55 }
 0x35a   :  { %v1787_v56 = vpop.f32.mrb[56].mxu0 }
 0x35b   :  { %v1459_v57 = vadd.f32 %v1787_v56, %v2481_v36  ;;  %v1450_v59 = vpop.f32.mrb[57].mxu0 }
 0x35c   :  { %v1451_v60 = vadd.f32 %v2481_v36, %v1450_v59  ;;  %v1788_v61 = vpop.f32.mrb[58].mxu0 }
 0x35d   :  { %1556 = vst.msk [vmem:[%s2652_s9 + $0x50] sm:$0xff] %vm1545_vm0, %v1459_v57  ;;  %v1462_v62 = vadd.f32 %v1788_v61, %v2481_v36  ;;  %v1453_v63 = vpop.f32.mrb[59].mxu0 }
 0x35e   :  { %1554 = vst.msk [vmem:[%s2652_s9 + $0x40] sm:$0xff] %vm1545_vm0, %v1451_v60  ;;  %v1454_v2 = vadd.f32 %v2481_v36, %v1453_v63 }
 0x35f   :  { %1557 = vst.msk [vmem:[%s2652_s9 + $0x58] sm:$0xff] %vm1545_vm0, %v1462_v62 }
 0x360   :  { %1555 = vst.msk [vmem:[%s2652_s9 + $0x48] sm:$0xff] %vm1545_vm0, %v1454_v2 }
 0x372   :  { %v1791_v3 = vpop.f32.mrb[60].mxu0 }
 0x373   :  { %v1475_v4 = vadd.f32 %v1791_v3, %v2481_v36  ;;  %v1466_v5 = vpop.f32.mrb[61].mxu0 }
 0x374   :  { %v1467_v6 = vadd.f32 %v2481_v36, %v1466_v5  ;;  %v1792_v41 = vpop.f32.mrb[62].mxu0 }
 0x375   :  { %1560 = vst.msk [vmem:[%s2652_s9 + $0x70] sm:$0xff] %vm1545_vm0, %v1475_v4  ;;  %v1478_v7 = vadd.f32 %v1792_v41, %v2481_v36  ;;  %v1469_v8 = vpop.f32.mrb[63].mxu0 }
 0x376   :  { %1558 = vst.msk [vmem:[%s2652_s9 + $0x60] sm:$0xff] %vm1545_vm0, %v1467_v6  ;;  %v1470_v9 = vadd.f32 %v2481_v36, %v1469_v8 }
 0x377   :  { %1561 = vst.msk [vmem:[%s2652_s9 + $0x78] sm:$0xff] %vm1545_vm0, %v1478_v7 }
 0x378   :  { %1559 = vst.msk [vmem:[%s2652_s9 + $0x68] sm:$0xff] %vm1545_vm0, %v1470_v9 }
 0x38a   :  { %v1795_v10 = vpop.f32.mrb[64].mxu0 }
 0x38b   :  { %v1491_v11 = vadd.f32 %v1795_v10, %v2481_v36  ;;  %v1482_v12 = vpop.f32.mrb[65].mxu0 }
 0x38c   :  { %v1483_v13 = vadd.f32 %v2481_v36, %v1482_v12  ;;  %v1796_v14 = vpop.f32.mrb[66].mxu0 }
 0x38d   :  { %1564 = vst.msk [vmem:[%s2652_s9 + $0x90] sm:$0xff] %vm1545_vm0, %v1491_v11  ;;  %v1494_v15 = vadd.f32 %v1796_v14, %v2481_v36  ;;  %v1485_v16 = vpop.f32.mrb[67].mxu0 }
 0x38e   :  { %1562 = vst.msk [vmem:[%s2652_s9 + $0x80] sm:$0xff] %vm1545_vm0, %v1483_v13  ;;  %v1486_v17 = vadd.f32 %v2481_v36, %v1485_v16 }
 0x38f   :  { %1565 = vst.msk [vmem:[%s2652_s9 + $0x98] sm:$0xff] %vm1545_vm0, %v1494_v15 }
 0x390   :  { %1563 = vst.msk [vmem:[%s2652_s9 + $0x88] sm:$0xff] %vm1545_vm0, %v1486_v17 }
 0x3a2   :  { %v1799_v18 = vpop.f32.mrb[68].mxu0 }
 0x3a3   :  { %v1507_v19 = vadd.f32 %v1799_v18, %v2481_v36  ;;  %v1498_v51 = vpop.f32.mrb[69].mxu0 }
 0x3a4   :  { %v1499_v50 = vadd.f32 %v2481_v36, %v1498_v51  ;;  %v1800_v20 = vpop.f32.mrb[70].mxu0 }
 0x3a5   :  { %1568 = vst.msk [vmem:[%s2652_s9 + $0xb0] sm:$0xff] %vm1545_vm0, %v1507_v19  ;;  %v1510_v21 = vadd.f32 %v1800_v20, %v2481_v36  ;;  %v1501_v0 = vpop.f32.mrb[71].mxu0 }
 0x3a6   :  { %1566 = vst.msk [vmem:[%s2652_s9 + $0xa0] sm:$0xff] %vm1545_vm0, %v1499_v50  ;;  %v1502_v22 = vadd.f32 %v2481_v36, %v1501_v0 }
 0x3a7   :  { %1569 = vst.msk [vmem:[%s2652_s9 + $0xb8] sm:$0xff] %vm1545_vm0, %v1510_v21 }
 0x3a8   :  { %1567 = vst.msk [vmem:[%s2652_s9 + $0xa8] sm:$0xff] %vm1545_vm0, %v1502_v22 }
 0x3ba   :  { %v1803_v23 = vpop.f32.mrb[72].mxu0 }
 0x3bb   :  { %v1523_v31 = vadd.f32 %v1803_v23, %v2481_v36  ;;  %v1514_v24 = vpop.f32.mrb[73].mxu0 }
 0x3bc   :  { %v1515_v25 = vadd.f32 %v2481_v36, %v1514_v24  ;;  %v1804_v26 = vpop.f32.mrb[74].mxu0 }
 0x3bd   :  { %1572 = vst.msk [vmem:[%s2652_s9 + $0xd0] sm:$0xff] %vm1545_vm0, %v1523_v31  ;;  %v1526_v27 = vadd.f32 %v1804_v26, %v2481_v36  ;;  %v1517_v58 = vpop.f32.mrb[75].mxu0 }
 0x3be   :  { %1570 = vst.msk [vmem:[%s2652_s9 + $0xc0] sm:$0xff] %vm1545_vm0, %v1515_v25  ;;  %v1518_v28 = vadd.f32 %v2481_v36, %v1517_v58 }
 0x3bf   :  { %1573 = vst.msk [vmem:[%s2652_s9 + $0xd8] sm:$0xff] %vm1545_vm0, %v1526_v27 }
 0x3c0   :  { %1571 = vst.msk [vmem:[%s2652_s9 + $0xc8] sm:$0xff] %vm1545_vm0, %v1518_v28 }
 0x3d2   :  { %v1807_v30 = vpop.f32.mrb[76].mxu0 }
 0x3d3   :  { %v1539_v32 = vadd.f32 %v1807_v30, %v2481_v36  ;;  %v1530_v33 = vpop.f32.mrb[77].mxu0 }
 0x3d4   :  { %v1531_v34 = vadd.f32 %v2481_v36, %v1530_v33  ;;  %v1808_v35 = vpop.f32.mrb[78].mxu0 }
 0x3d5   :  { %1576 = vst.msk [vmem:[%s2652_s9 + $0xf0] sm:$0xff] %vm1545_vm0, %v1539_v32  ;;  %v1542_v48 = vadd.f32 %v1808_v35, %v2481_v36  ;;  %v1533_v46 = vpop.f32.mrb[79].mxu0 }
 0x3d6   :  { %1574 = vst.msk [vmem:[%s2652_s9 + $0xe0] sm:$0xff] %vm1545_vm0, %v1531_v34  ;;  %v1534_v37 = vadd.f32 %v2481_v36, %v1533_v46 }
 0x3d7   :  { %1577 = vst.msk [vmem:[%s2652_s9 + $0xf8] sm:$0xff] %vm1545_vm0, %v1542_v48 }
 0x3d8   :  { %1575 = vst.msk [vmem:[%s2652_s9 + $0xe8] sm:$0xff] %vm1545_vm0, %v1534_v37 }

</bundles_post_ra>
